<compile_context>
chip_gen: v5e
topology: v5e:2x2
jax: 0.10.0
libtpu: 0.0.40
codegen_flags: <defaults>
</compile_context>

<pallas_src>
import functools
import math

import jax
import jax.numpy as jnp
from jax.experimental import pallas as pl
from jax.experimental.pallas import tpu as pltpu

EPS = 1e-5                 # nn.LayerNorm default eps
_SLACK_BYTES = 2 << 20

# Memoized probe result for pl.Buffered(1) single-buffering of invariant
# operands: None = not tried yet, True/False afterwards.
_SINGLE_BUFFER_OK = None


def _round_up(x, m):
    return ((x + m - 1) // m) * m


def _vmem_capacity_bytes():
    try:
        return int(pltpu.get_tpu_info().vmem_capacity_bytes)
    except Exception:
        return 64 << 20    # assume the smallest current-gen VMEM (v7x)


# ----------------------------------------------------------------------------
# Kernel bodies
# ----------------------------------------------------------------------------
@functools.lru_cache(maxsize=None)
def _make_kernel(do_norm: bool, use_scratch: bool):
    def _norm_rows(x):
        # LayerNorm statistics in f32 on every generation (v5e has no bf16
        # VPU/EUP).  Garbage rows of a partial last row tile may turn
        # non-finite here; they are masked on writeback so results stay
        # correct -- do not reduce across rows.
        x = x.astype(jnp.float32)
        if not do_norm:
            return x
        mean = jnp.mean(x, axis=-1, keepdims=True)
        centered = x - mean
        var = jnp.mean(centered * centered, axis=-1, keepdims=True)
        return centered * jax.lax.rsqrt(var + EPS)

    if use_scratch:
        def kernel(x_ref, w_ref, b_ref, o_ref, xn_ref):
            # xn_ref caches the (normalized) row tile across column tiles.
            # Only valid because grid axis 1 (columns) is the innermost axis
            # and is marked "arbitrary" while only axis 0 is "parallel":
            # do NOT reorder the grid or mark axis 1 parallel.
            @pl.when(pl.program_id(1) == 0)
            def _():
                xn_ref[...] = _norm_rows(x_ref[...]).astype(xn_ref.dtype)

            acc = jnp.dot(xn_ref[...], w_ref[...],
                          preferred_element_type=jnp.float32)
            o_ref[...] = (acc + b_ref[...]).astype(o_ref.dtype)

        return kernel

    def kernel(x_ref, w_ref, b_ref, o_ref):
        # Single column tile: feed the normalized rows straight into the MXU,
        # no xn scratch round-trip (saves a VMEM store + reload per step;
        # v5e has a single vector-store slot).
        xn = _norm_rows(x_ref[...]).astype(w_ref.dtype)
        acc = jnp.dot(xn, w_ref[...], preferred_element_type=jnp.float32)
        o_ref[...] = (acc + b_ref[...]).astype(o_ref.dtype)

    return kernel


# ----------------------------------------------------------------------------
# Tile selection (VMEM-budget aware, per the perf review)
# ----------------------------------------------------------------------------
def _select_tiles(rows, D, N, in_bytes, out_bytes, cd_bytes, budget,
                  block_rows=None, block_cols=None):
    # Columns: tile the weight only when a *double-buffered* compute-dtype
    # copy would eat more than a quarter of the VMEM budget.  Keep multiples
    # of 256 (v6e/v7x MXU is 2x256^2); v5e's 128^2 MXU is full either way.
    if block_cols is None:
        if N % 128 == 0 and 2 * D * N * cd_bytes > budget // 4:
            block_cols = 512 if N % 512 == 0 else (256 if N % 256 == 0 else 128)
        else:
            block_cols = N
    block_cols = int(block_cols)

    # Rows: as large as the budget allows (kernel is HBM-bound; >=512-row
    # tiles reach ~85% of the HBM roofline vs ~63% at 256).
    if block_rows is None:
        target = 1024
        if block_cols < N:
            # Weight is re-read once per row tile when column-tiled; balance
            # weight vs x traffic: block_rows * in_bytes >~ 2 * D * cd_bytes.
            target = max(target,
                         _round_up((2 * D * cd_bytes) // max(in_bytes, 1), 16))
        block_rows = min(target, _round_up(rows, 16))
        # Keep >= 2 row tiles so v7x's two TensorCores both get work.
        if rows >= 32:
            block_rows = min(block_rows, max(16, _round_up((rows + 1) // 2, 16)))
    block_rows = int(block_rows)

    def footprint(br, bc):
        f = (2 * br * D * in_bytes           # x tiles (double-buffered)
             + 2 * D * bc * cd_bytes         # weight tiles (conservatively x2)
             + 2 * 8 * bc * 4                # bias tiles (sublane-padded, f32)
             + 2 * br * bc * out_bytes)      # out tiles
        if bc < N:
            f += br * D * cd_bytes           # xn scratch
        return f

    # Never clamp the VMEM limit below the footprint -- shrink the tiles.
    while footprint(block_rows, block_cols) + _SLACK_BYTES > budget:
        if block_rows > 64:
            block_rows = max(64, _round_up(block_rows // 2, 16))
        elif block_cols > 128 and block_cols % 128 == 0:
            block_cols = max(128, (block_cols // 2) // 128 * 128)
        elif block_rows > 16:
            block_rows = max(16, _round_up(block_rows // 2, 8))
        else:
            break

    return block_rows, block_cols, footprint(block_rows, block_cols)


# ----------------------------------------------------------------------------
# Fused (LayerNorm +) Linear
# ----------------------------------------------------------------------------
def _fold_affine(w, b, gamma, beta, compute_dtype):
    """Fold the LayerNorm affine (and Linear bias) into the projection."""
    n = w.shape[1]
    w_f32 = w.astype(jnp.float32)
    if gamma is not None:
        w_fold = gamma.astype(jnp.float32)[:, None] * w_f32
        b_fold = beta.astype(jnp.float32) @ w_f32
    else:
        w_fold = w_f32
        b_fold = jnp.zeros((n,), jnp.float32)
    if b is not None:
        b_fold = b_fold + b.astype(jnp.float32)
    return w_fold.astype(compute_dtype), b_fold.reshape(1, n)


def fused_norm_linear(x, w, b=None, *, gamma=None, beta=None,
                      compute_dtype=jnp.bfloat16, out_dtype=None,
                      block_rows=None, block_cols=None):
    """out = LayerNorm(x) @ W + b (LayerNorm skipped when gamma is None).

    x: [..., D], w: [D, N] -> out: [..., N].  MXU operands are
    `compute_dtype` (bf16 by default); LayerNorm statistics and the
    accumulator stay f32.  bf16 activation I/O is supported by passing a
    bf16 `x` / `out_dtype`.
    """
    orig_shape = x.shape
    D = orig_shape[-1]
    N = w.shape[1]
    rows = int(math.prod(orig_shape[:-1])) if len(orig_shape) > 1 else 1
    x2 = x.reshape(rows, D)
    out_dtype = x.dtype if out_dtype is None else out_dtype
    do_norm = gamma is not None

    w_fold, b_fold = _fold_affine(w, b, gamma, beta, compute_dtype)

    in_bytes = x2.dtype.itemsize
    out_bytes = jnp.dtype(out_dtype).itemsize
    cd_bytes = jnp.dtype(compute_dtype).itemsize

    vmem_cap = _vmem_capacity_bytes()
    budget = (vmem_cap * 3) // 4
    br, bc, fp = _select_tiles(rows, D, N, in_bytes, out_bytes, cd_bytes,
                               budget, block_rows, block_cols)

    use_scratch = bc < N
    row_tiles = pl.cdiv(rows, br)
    col_tiles = pl.cdiv(N, bc)
    grid = (row_tiles, col_tiles)
    vmem_limit = int(min(vmem_cap, max(fp + _SLACK_BYTES, 16 << 20)))

    # Weight is re-read from HBM once per row tile when column-tiled; it is
    # fetched once when it stays resident (block index never changes).
    w_reads = row_tiles if col_tiles > 1 else 1
    cost = pl.CostEstimate(
        flops=2 * rows * D * N,
        transcendentals=rows if do_norm else 0,
        bytes_accessed=(rows * D * in_bytes
                        + w_reads * D * N * cd_bytes
                        + N * 4
                        + rows * N * out_bytes),
    )

    kernel = _make_kernel(do_norm, use_scratch)

    def build_and_run(single_buffer_invariants):
        wb_kw = ({"pipeline_mode": pl.Buffered(buffer_count=1)}
                 if single_buffer_invariants else {})
        in_specs = [
            pl.BlockSpec((br, D), lambda i, j: (i, 0)),               # x rows
            pl.BlockSpec((D, bc), lambda i, j: (0, j), **wb_kw),      # folded W
            pl.BlockSpec((1, bc), lambda i, j: (0, j), **wb_kw),      # folded b
        ]
        scratch = [pltpu.VMEM((br, D), compute_dtype)] if use_scratch else []
        return pl.pallas_call(
            kernel,
            out_shape=jax.ShapeDtypeStruct((rows, N), out_dtype),
            grid_spec=pltpu.PrefetchScalarGridSpec(
                num_scalar_prefetch=0,
                grid=grid,
                in_specs=in_specs,
                out_specs=pl.BlockSpec((br, bc), lambda i, j: (i, j)),
                scratch_shapes=scratch,
            ),
            compiler_params=pltpu.CompilerParams(
                dimension_semantics=("parallel", "arbitrary"),
                vmem_limit_bytes=vmem_limit),
            cost_estimate=cost,
        )(x2, w_fold, b_fold)

    global _SINGLE_BUFFER_OK
    want_single_buffer = (col_tiles == 1)     # W'/b' block index never changes
    # NOTE: the Buffered(1) fallback only triggers when called eagerly.
    if want_single_buffer and _SINGLE_BUFFER_OK is not False:
        try:
            out2 = build_and_run(True)
            _SINGLE_BUFFER_OK = True
        except Exception:
            _SINGLE_BUFFER_OK = False
            out2 = build_and_run(False)
    else:
        out2 = build_and_run(False)

    return out2.reshape(orig_shape[:-1] + (N,))


# Pure-JAX emulation of the kernel's numerics (same folding / bf16 operands);
# used only for a tight end-to-end plumbing check of the composed forward.
def _norm_linear_emul(x, w, b=None, *, gamma=None, beta=None,
                      compute_dtype=jnp.bfloat16, out_dtype=None):
    out_dtype = x.dtype if out_dtype is None else out_dtype
    w_fold, b_fold = _fold_affine(w, b, gamma, beta, compute_dtype)
    xf = x.astype(jnp.float32)
    if gamma is not None:
        mean = jnp.mean(xf, axis=-1, keepdims=True)
        centered = xf - mean
        var = jnp.mean(centered * centered, axis=-1, keepdims=True)
        xf = centered * jax.lax.rsqrt(var + EPS)
    y = jnp.dot(xf.astype(compute_dtype), w_fold,
                preferred_element_type=jnp.float32) + b_fold
    return y.astype(out_dtype)


# ----------------------------------------------------------------------------
# PTE_7 forward (Pallas-backed) and pure-f32 reference
# ----------------------------------------------------------------------------
def pte7_forward(params, x, *, compute_dtype=jnp.bfloat16, linear_fn=None):
    """PTE_7.forward with every (PreNorm+)Linear running as a Pallas kernel.

    Inference semantics: dropout layers are identity; mask=None only.
    """
    if linear_fn is None:
        linear_fn = fused_norm_linear
    heads, dim_head, scale = params["heads"], params["dim_head"], params["scale"]
    hp = jax.lax.Precision.HIGHEST
    b, n, d = x.shape
    s = n + 1

    cls = jnp.broadcast_to(params["cls_token"], (b, 1, d)).astype(x.dtype)
    h = jnp.concatenate([cls, x], axis=1)
    h = h + params["pos_embedding"][:, :s].astype(x.dtype)
    # TODO(synk): emb_dropout / attention / FFN dropout are identity here
    # (inference); training-mode stochastic dropout is not implemented.
    # TODO(synk): the optional attention `mask` path is not implemented.

    for layer in params["layers"]:
        # ---- Residual(PreNorm(Attention)): PreNorm + to_qkv fused ----------
        qkv = linear_fn(h, layer["w_qkv"], None,
                        gamma=layer["ln1_g"], beta=layer["ln1_b"],
                        compute_dtype=compute_dtype)
        q, k, v = jnp.split(qkv, 3, axis=-1)
        q, k, v = (t.reshape(b, s, heads, dim_head).transpose(0, 2, 1, 3)
                   for t in (q, k, v))
        dots = jnp.einsum("bhid,bhjd->bhij", q.astype(jnp.float32),
                          k.astype(jnp.float32), precision=hp) * scale
        attn = jax.nn.softmax(dots, axis=-1)
        # TODO(synk): scores/softmax/AV stay in plain JAX here; a fused
        # flash-attention Pallas kernel is a separate follow-up.
        o = jnp.einsum("bhij,bhjd->bhid", attn, v.astype(jnp.float32),
                       precision=hp)
        o = o.transpose(0, 2, 1, 3).reshape(b, s, heads * dim_head)
        o = linear_fn(o.astype(h.dtype), layer["w_out"], layer["b_out"],
                      compute_dtype=compute_dtype)
        h = h + o

        # ---- Residual(PreNorm(FeedForward)): PreNorm + FFN-in fused --------
        f = linear_fn(h, layer["w_ff1"], layer["b_ff1"],
                      gamma=layer["ln2_g"], beta=layer["ln2_b"],
                      compute_dtype=compute_dtype)
        f = jax.nn.gelu(f.astype(jnp.float32), approximate=False).astype(h.dtype)
        f = linear_fn(f, layer["w_ff2"], layer["b_ff2"],
                      compute_dtype=compute_dtype)
        h = h + f

    return h[:, 0]                      # cls token; to_latent is Identity


def _layer_norm_f32(x, g, b):
    xf = x.astype(jnp.float32)
    mean = jnp.mean(xf, axis=-1, keepdims=True)
    var = jnp.mean((xf - mean) ** 2, axis=-1, keepdims=True)
    return (xf - mean) * jax.lax.rsqrt(var + EPS) * g + b


def prenorm_linear_ref(x, gamma, beta, w, b=None):
    y = jnp.dot(_layer_norm_f32(x, gamma, beta), w.astype(jnp.float32),
                precision=jax.lax.Precision.HIGHEST)
    if b is not None:
        y = y + b.astype(jnp.float32)
    return y


def pte7_forward_ref(params, x):
    """Pure-JAX f32 transcription of PTE_7.forward (inference, mask=None)."""
    heads, dim_head, scale = params["heads"], params["dim_head"], params["scale"]
    hp = jax.lax.Precision.HIGHEST
    b, n, d = x.shape
    s = n + 1
    cls = jnp.broadcast_to(params["cls_token"].astype(jnp.float32), (b, 1, d))
    h = jnp.concatenate([cls, x.astype(jnp.float32)], axis=1)
    h = h + params["pos_embedding"][:, :s].astype(jnp.float32)
    for layer in params["layers"]:
        y = _layer_norm_f32(h, layer["ln1_g"], layer["ln1_b"])
        qkv = jnp.dot(y, layer["w_qkv"].astype(jnp.float32), precision=hp)
        q, k, v = jnp.split(qkv, 3, axis=-1)
        q, k, v = (t.reshape(b, s, heads, dim_head).transpose(0, 2, 1, 3)
                   for t in (q, k, v))
        dots = jnp.einsum("bhid,bhjd->bhij", q, k, precision=hp) * scale
        attn = jax.nn.softmax(dots, axis=-1)
        o = jnp.einsum("bhij,bhjd->bhid", attn, v, precision=hp)
        o = o.transpose(0, 2, 1, 3).reshape(b, s, heads * dim_head)
        o = jnp.dot(o, layer["w_out"].astype(jnp.float32),
                    precision=hp) + layer["b_out"]
        h = h + o
        y = _layer_norm_f32(h, layer["ln2_g"], layer["ln2_b"])
        f = jnp.dot(y, layer["w_ff1"].astype(jnp.float32),
                    precision=hp) + layer["b_ff1"]
        f = jax.nn.gelu(f, approximate=False)
        f = jnp.dot(f, layer["w_ff2"].astype(jnp.float32),
                    precision=hp) + layer["b_ff2"]
        h = h + f
    return h[:, 0]


# ----------------------------------------------------------------------------
# Demo / checks
# ----------------------------------------------------------------------------
if __name__ == "__main__":
    B, N_PATCH, DIM = 2, 31, 128
    HEADS, DIM_HEAD, MLP_DIM, DEPTH = 4, 32, 256, 2
    INNER = HEADS * DIM_HEAD                    # 128

    key = jax.random.PRNGKey(0)
    keys = jax.random.split(key, 4 + DEPTH)

    def nrm(k, shape, std=1.0):
        return std * jax.random.normal(k, shape, dtype=jnp.float32)

    x = nrm(keys[0], (B, N_PATCH, DIM))
    params = {
        "heads": HEADS,
        "dim_head": DIM_HEAD,
        "scale": DIM ** (-0.5),     # PTE_7's Attention scales by dim, not dim_head
        "cls_token": nrm(keys[1], (1, 1, DIM)),
        "pos_embedding": nrm(keys[2], (1, N_PATCH + 1, DIM)),
        "layers": [],
    }
    for li in range(DEPTH):
        lk = jax.random.split(keys[4 + li], 11)
        params["layers"].append({
            "ln1_g": 1.0 + 0.1 * nrm(lk[0], (DIM,)),
            "ln1_b": 0.1 * nrm(lk[1], (DIM,)),
            "w_qkv": nrm(lk[2], (DIM, 3 * INNER), std=DIM ** -0.5),
            "w_out": nrm(lk[3], (INNER, DIM), std=INNER ** -0.5),
            "b_out": 0.02 * nrm(lk[4], (DIM,)),
            "ln2_g": 1.0 + 0.1 * nrm(lk[5], (DIM,)),
            "ln2_b": 0.1 * nrm(lk[6], (DIM,)),
            "w_ff1": nrm(lk[7], (DIM, MLP_DIM), std=DIM ** -0.5),
            "b_ff1": 0.02 * nrm(lk[8], (MLP_DIM,)),
            "w_ff2": nrm(lk[9], (MLP_DIM, DIM), std=MLP_DIM ** -0.5),
            "b_ff2": 0.02 * nrm(lk[10], (DIM,)),
        })

    lyr0 = params["layers"][0]
    x_bb = nrm(keys[3], (B, 64, DIM))
    y_ref = prenorm_linear_ref(x_bb, lyr0["ln1_g"], lyr0["ln1_b"], lyr0["w_qkv"])

    # 1) Fused PreNorm + to_qkv projection (dim -> 3*inner_dim), bf16 MXU,
    #    f32 I/O, single resident weight tile.
    y_bb = jax.block_until_ready(
        fused_norm_linear(x_bb, lyr0["w_qkv"], None,
                          gamma=lyr0["ln1_g"], beta=lyr0["ln1_b"]))
    assert y_bb.shape == (B, 64, 3 * INNER)
    err1 = float(jnp.max(jnp.abs(y_bb - y_ref)))
    assert jnp.allclose(y_bb, y_ref, atol=2e-2, rtol=2e-2), f"prenorm+qkv err {err1}"

    # 1b) Same block with bf16 activation I/O (halves HBM traffic on the
    #     mem-bound roofline; biggest relative win on v5e).
    y_bb16 = jax.block_until_ready(
        fused_norm_linear(x_bb.astype(jnp.bfloat16), lyr0["w_qkv"], None,
                          gamma=lyr0["ln1_g"], beta=lyr0["ln1_b"]))
    err1b = float(jnp.max(jnp.abs(y_bb16.astype(jnp.float32) - y_ref)))
    assert jnp.allclose(y_bb16.astype(jnp.float32), y_ref,
                        atol=8e-2, rtol=8e-2), f"bf16-I/O err {err1b}"

    # 1c) Forced column tiling exercises the xn-scratch reuse path.
    y_ct = jax.block_until_ready(
        fused_norm_linear(x_bb, lyr0["w_qkv"], None,
                          gamma=lyr0["ln1_g"], beta=lyr0["ln1_b"],
                          block_cols=128))
    err1c = float(jnp.max(jnp.abs(y_ct - y_ref)))
    assert jnp.allclose(y_ct, y_ref, atol=2e-2, rtol=2e-2), f"col-tiled err {err1c}"

    # 2) Full PTE_7 forward: Pallas-backed vs an identically-structured pure
    #    JAX emulation of the kernel numerics (tight plumbing check) ...
    out_pallas = jax.block_until_ready(pte7_forward(params, x))
    out_emul = pte7_forward(params, x, linear_fn=_norm_linear_emul)
    assert out_pallas.shape == (B, DIM)
    err2 = float(jnp.max(jnp.abs(out_pallas - out_emul)))
    assert jnp.allclose(out_pallas, out_emul, atol=1e-2, rtol=1e-2), \
        f"PTE_7 plumbing err {err2}"

    #    ... and vs the pure-f32 module reference (bf16 MXU operands over two
    #    transformer layers -> relaxed tolerance, deliberate precision trade).
    out_ref = pte7_forward_ref(params, x)
    err3 = float(jnp.max(jnp.abs(out_pallas - out_ref)))
    assert jnp.allclose(out_pallas, out_ref, atol=0.5, rtol=0.25), \
        f"PTE_7 vs f32 reference err {err3}"

    # 3) Performance path: bf16 activations through the whole stack.
    out_bf16 = jax.block_until_ready(
        pte7_forward(params, x.astype(jnp.bfloat16)))
    assert out_bf16.shape == (B, DIM) and out_bf16.dtype == jnp.bfloat16
    assert bool(jnp.all(jnp.isfinite(out_bf16)))

    print("KERNEL_OK")
</pallas_src>

<mosaic_0001>
module attributes {stable_mosaic.version = 11 : i64} {
  func.func @kernel(%arg0: i32, %arg1: i32, %arg2: memref<64x128xf32, #tpu.memory_space<vmem>>, %arg3: memref<128x384xbf16, #tpu.memory_space<vmem>>, %arg4: memref<1x384xf32, #tpu.memory_space<vmem>>, %arg5: memref<64x384xf32, #tpu.memory_space<vmem>>) attributes {dimension_semantics = [#tpu.dimension_semantics<parallel>, #tpu.dimension_semantics<arbitrary>], iteration_bounds = array<i64: 2, 1>, scalar_prefetch = 0 : i64, scratch_operands = 0 : i64, tpu.core_type = #tpu.core_type<tc>, window_params = [{transform_indices = @transform_0, window_bounds = array<i64: 64, 128>}, {pipeline_mode = #tpu.pipeline_mode<synchronous>, transform_indices = @transform_1, window_bounds = array<i64: 128, 384>}, {pipeline_mode = #tpu.pipeline_mode<synchronous>, transform_indices = @transform_2, window_bounds = array<i64: 1, 384>}, {transform_indices = @transform_3, window_bounds = array<i64: 64, 384>}]} {
    %c0 = arith.constant 0 : index
    %c0_0 = arith.constant 0 : index
    %0 = vector.load %arg2[%c0, %c0_0] : memref<64x128xf32, #tpu.memory_space<vmem>>, vector<64x128xf32>
    %cst = arith.constant dense<0.000000e+00> : vector<64xf32>
    %1 = vector.multi_reduction <add>, %0, %cst [1] : vector<64x128xf32> to vector<64xf32>
    %2 = vector.shape_cast %1 : vector<64xf32> to vector<64x1xf32>
    %cst_1 = arith.constant 1.280000e+02 : f32
    %3 = vector.broadcast %cst_1 : f32 to vector<64x1xf32>
    %4 = arith.divf %2, %3 : vector<64x1xf32>
    %5 = vector.broadcast %4 : vector<64x1xf32> to vector<64x128xf32>
    %6 = arith.subf %0, %5 : vector<64x128xf32>
    %7 = arith.mulf %6, %6 : vector<64x128xf32>
    %cst_2 = arith.constant dense<0.000000e+00> : vector<64xf32>
    %8 = vector.multi_reduction <add>, %7, %cst_2 [1] : vector<64x128xf32> to vector<64xf32>
    %9 = vector.shape_cast %8 : vector<64xf32> to vector<64x1xf32>
    %cst_3 = arith.constant 1.280000e+02 : f32
    %10 = vector.broadcast %cst_3 : f32 to vector<64x1xf32>
    %11 = arith.divf %9, %10 : vector<64x1xf32>
    %cst_4 = arith.constant 9.99999974E-6 : f32
    %12 = vector.broadcast %cst_4 : f32 to vector<64x1xf32>
    %13 = arith.addf %11, %12 : vector<64x1xf32>
    %14 = math.rsqrt %13 : vector<64x1xf32>
    %15 = vector.broadcast %14 : vector<64x1xf32> to vector<64x128xf32>
    %16 = arith.mulf %6, %15 : vector<64x128xf32>
    %17 = arith.truncf %16 : vector<64x128xf32> to vector<64x128xbf16>
    %c0_5 = arith.constant 0 : index
    %c0_6 = arith.constant 0 : index
    %18 = vector.load %arg3[%c0_5, %c0_6] : memref<128x384xbf16, #tpu.memory_space<vmem>>, vector<128x384xbf16>
    %cst_7 = arith.constant dense<0.000000e+00> : vector<64x384xf32>
    %19 = tpu.matmul %17, %18, %cst_7 {dimension_numbers = #tpu.dot_dimension_numbers<[1], [0], [0], [1], [0, 0, 1, 1], [], []>} : vector<64x128xbf16>, vector<128x384xbf16>, vector<64x384xf32> -> vector<64x384xf32>
    %c0_8 = arith.constant 0 : index
    %c0_9 = arith.constant 0 : index
    %20 = vector.load %arg4[%c0_8, %c0_9] : memref<1x384xf32, #tpu.memory_space<vmem>>, vector<1x384xf32>
    %21 = vector.broadcast %20 : vector<1x384xf32> to vector<64x384xf32>
    %22 = arith.addf %19, %21 : vector<64x384xf32>
    %c0_10 = arith.constant 0 : index
    %c0_11 = arith.constant 0 : index
    %23 = vector.load %arg5[%c0_10, %c0_11] : memref<64x384xf32, #tpu.memory_space<vmem>>, vector<64x384xf32>
    tpu.vector_store %arg5[%c0_10, %c0_11], %22 {strides = array<i32>} : memref<64x384xf32, #tpu.memory_space<vmem>>, vector<64x384xf32>,
    return
  }
  func.func @transform_0(%arg0: i32, %arg1: i32) -> (i32, i32) {
    %c0_i32 = arith.constant 0 : i32
    %c0_i32_0 = arith.constant 0 : i32
    return %arg0, %c0_i32 : i32, i32
  }
  func.func @transform_1(%arg0: i32, %arg1: i32) -> (i32, i32) {
    %c0_i32 = arith.constant 0 : i32
    %c0_i32_0 = arith.constant 0 : i32
    return %c0_i32, %arg1 : i32, i32
  }
  func.func @transform_2(%arg0: i32, %arg1: i32) -> (i32, i32) {
    %c0_i32 = arith.constant 0 : i32
    %c0_i32_0 = arith.constant 0 : i32
    return %c0_i32, %arg1 : i32, i32
  }
  func.func @transform_3(%arg0: i32, %arg1: i32) -> (i32, i32) {
    %c0_i32 = arith.constant 0 : i32
    return %arg0, %arg1 : i32, i32
  }
}

module attributes {stable_mosaic.version = 11 : i64} {
  func.func @kernel(%arg0: i32, %arg1: i32, %arg2: memref<64x128xf32, #tpu.memory_space<vmem>>, %arg3: memref<128x384xbf16, #tpu.memory_space<vmem>>, %arg4: memref<1x384xf32, #tpu.memory_space<vmem>>, %arg5: memref<64x384xf32, #tpu.memory_space<vmem>>) attributes {dimension_semantics = [#tpu.dimension_semantics<parallel>, #tpu.dimension_semantics<arbitrary>], iteration_bounds = array<i64: 2, 1>, scalar_prefetch = 0 : i64, scratch_operands = 0 : i64, tpu.core_type = #tpu.core_type<tc>, window_params = [{transform_indices = @transform_0, window_bounds = array<i64: 64, 128>}, {transform_indices = @transform_1, window_bounds = array<i64: 128, 384>}, {transform_indices = @transform_2, window_bounds = array<i64: 1, 384>}, {transform_indices = @transform_3, window_bounds = array<i64: 64, 384>}]} {
    %c0 = arith.constant 0 : index
    %c0_0 = arith.constant 0 : index
    %0 = vector.load %arg2[%c0, %c0_0] : memref<64x128xf32, #tpu.memory_space<vmem>>, vector<64x128xf32>
    %cst = arith.constant dense<0.000000e+00> : vector<64xf32>
    %1 = vector.multi_reduction <add>, %0, %cst [1] : vector<64x128xf32> to vector<64xf32>
    %2 = vector.shape_cast %1 : vector<64xf32> to vector<64x1xf32>
    %cst_1 = arith.constant 1.280000e+02 : f32
    %3 = vector.broadcast %cst_1 : f32 to vector<64x1xf32>
    %4 = arith.divf %2, %3 : vector<64x1xf32>
    %5 = vector.broadcast %4 : vector<64x1xf32> to vector<64x128xf32>
    %6 = arith.subf %0, %5 : vector<64x128xf32>
    %7 = arith.mulf %6, %6 : vector<64x128xf32>
    %cst_2 = arith.constant dense<0.000000e+00> : vector<64xf32>
    %8 = vector.multi_reduction <add>, %7, %cst_2 [1] : vector<64x128xf32> to vector<64xf32>
    %9 = vector.shape_cast %8 : vector<64xf32> to vector<64x1xf32>
    %cst_3 = arith.constant 1.280000e+02 : f32
    %10 = vector.broadcast %cst_3 : f32 to vector<64x1xf32>
    %11 = arith.divf %9, %10 : vector<64x1xf32>
    %cst_4 = arith.constant 9.99999974E-6 : f32
    %12 = vector.broadcast %cst_4 : f32 to vector<64x1xf32>
    %13 = arith.addf %11, %12 : vector<64x1xf32>
    %14 = math.rsqrt %13 : vector<64x1xf32>
    %15 = vector.broadcast %14 : vector<64x1xf32> to vector<64x128xf32>
    %16 = arith.mulf %6, %15 : vector<64x128xf32>
    %17 = arith.truncf %16 : vector<64x128xf32> to vector<64x128xbf16>
    %c0_5 = arith.constant 0 : index
    %c0_6 = arith.constant 0 : index
    %18 = vector.load %arg3[%c0_5, %c0_6] : memref<128x384xbf16, #tpu.memory_space<vmem>>, vector<128x384xbf16>
    %cst_7 = arith.constant dense<0.000000e+00> : vector<64x384xf32>
    %19 = tpu.matmul %17, %18, %cst_7 {dimension_numbers = #tpu.dot_dimension_numbers<[1], [0], [0], [1], [0, 0, 1, 1], [], []>} : vector<64x128xbf16>, vector<128x384xbf16>, vector<64x384xf32> -> vector<64x384xf32>
    %c0_8 = arith.constant 0 : index
    %c0_9 = arith.constant 0 : index
    %20 = vector.load %arg4[%c0_8, %c0_9] : memref<1x384xf32, #tpu.memory_space<vmem>>, vector<1x384xf32>
    %21 = vector.broadcast %20 : vector<1x384xf32> to vector<64x384xf32>
    %22 = arith.addf %19, %21 : vector<64x384xf32>
    %c0_10 = arith.constant 0 : index
    %c0_11 = arith.constant 0 : index
    %23 = vector.load %arg5[%c0_10, %c0_11] : memref<64x384xf32, #tpu.memory_space<vmem>>, vector<64x384xf32>
    tpu.vector_store %arg5[%c0_10, %c0_11], %22 {strides = array<i32>} : memref<64x384xf32, #tpu.memory_space<vmem>>, vector<64x384xf32>,
    return
  }
  func.func @transform_0(%arg0: i32, %arg1: i32) -> (i32, i32) {
    %c0_i32 = arith.constant 0 : i32
    %c0_i32_0 = arith.constant 0 : i32
    return %arg0, %c0_i32 : i32, i32
  }
  func.func @transform_1(%arg0: i32, %arg1: i32) -> (i32, i32) {
    %c0_i32 = arith.constant 0 : i32
    %c0_i32_0 = arith.constant 0 : i32
    return %c0_i32, %arg1 : i32, i32
  }
  func.func @transform_2(%arg0: i32, %arg1: i32) -> (i32, i32) {
    %c0_i32 = arith.constant 0 : i32
    %c0_i32_0 = arith.constant 0 : i32
    return %c0_i32, %arg1 : i32, i32
  }
  func.func @transform_3(%arg0: i32, %arg1: i32) -> (i32, i32) {
    %c0_i32 = arith.constant 0 : i32
    return %arg0, %arg1 : i32, i32
  }
}

</mosaic_0001>

<bundles_post_ra>
// kernel: tpu_custom_call.1
= control target key start
LH: loop header
LB: loop body
LE: loop exit
PB: predicated region body
PF: predicated region fallthrough
CT: control target
= control target key end

     0   :  { %s1599_s0 = inlined_call_operand.hbm [shape: f32[128,128], index: 0, kind: input, shape index: {}]   ;;  %s1600_s1 = inlined_call_operand.hbm [shape: bf16[128,384], index: 1, kind: input, shape index: {}]   ;;  %s1601_s2 = inlined_call_operand.hbm [shape: f32[1,384], index: 2, kind: input, shape index: {}]   ;;  %s1602_s3 = inlined_call_operand.hbm [shape: f32[128,384], index: 3, kind: output, shape index: {}]  }
   0x1   :  { %1603 = sst [smem:[#allocation12_spill]] %s1600_s1 }
   0x2   :  { %8 = vsyncpa [#allocation3], 0 }
   0x3   :  { %10 = vsyncpa [#allocation3 + $0x1], 0 }
   0x4   :  { %11 = vsyncpa [#allocation6], 0 }
   0x5   :  { %12 = vsyncpa [#allocation4], 0 }
   0x6   :  { %14 = vsyncpa [#allocation4 + $0x1], 0  ;;  %s1304_s12 = smov 0   ;;  %s1306_s13 = smov 0  }
   0x7   :  { %s1308_s14 = smov 0   ;;  %s1310_s15 = smov 0  }
   0x8   :  { %s1312_s16 = smov 0   ;;  %s1314_s17 = smov 0  }
   0x9 LB: > { %s840_s18 = sadd.s32 4294967295, %s1273_s17   ;;  %s841_s19 = sadd.s32 4294967294, %s1273_s17   ;;  %s1273_s17 = sphi %s1314_s17, %s20_s17   ;;  %s1269_s16 = sphi %s1312_s16, %s1618_s16   ;;  %s1265_s15 = sphi %s1310_s15, %s1617_s15   ;;  %s1261_s14 = sphi %s1308_s14, %s1616_s14   ;;  %s1257_s13 = sphi %s1306_s13, %s1615_s13   ;;  %s1253_s12 = sphi %s1304_s12, %s1614_s12  }
   0xa   : > { %p52_p0 = scmp.ne.s32.totalorder %s1257_s13, %s1253_s12  ;;  %p1338_p1 = scmp.eq.s32.totalorder %s840_s18, 0 }
   0xb   : > { %p1342_p2 = scmp.eq.s32.totalorder %s840_s18, 1  ;;  %p136_p3 = scmp.eq.s32.totalorder %s841_s19, 1 }
   0xc   : > { %p1348_p4 = por %p1338_p1, %p52_p0  ;;  %p842_p5 = scmp.ge.s32.totalorder %s1273_s17, 1 }
   0xd   : > { %p1353_p6 = por %p136_p3, %p52_p0  ;;  %p143_p7 = scmp.lt.s32.totalorder %s1273_s17, 3 }
   0xe   : > { %s1608_s1 = sld [smem:[#allocation12_spill]]  ;;  %s1275_s28 = smov [#allocation5]  }
   0xf   : > { %p1361_p8 = pnand %p842_p5, %p143_p7  ;;  %s159_s29 = sshll.u32 %s1275_s28, 4  ;;  %s160_s29 = int_to_ptr.vmem [resolvable:$true] %s159_s29 }
  0x10   : > { %p845_p11 = scmp.ge.s32.totalorder %s1273_s17, 2  ;;  %s174_s5 = sshll.u32 %s1601_s2, 4  ;;  %s175_s5 = int_to_ptr.hbm [resolvable:$true] %s174_s5 }
  0x11   : > { %p1001_p9 = pneg %p1361_p8  ;;  %s1276_s6 = smov 192  }
  0x12   : > { %s1277_s7 = smov 12   ;;  %s1278_s8 = smov [#allocation7]  }
  0x13   : > { %p1002_p10 = pnand %p1001_p9, %p1338_p1  ;;  %s176_s9 = sshll.u32 %s1278_s8, 4  ;;  %s177_s9 = int_to_ptr.vmem [resolvable:$true] %s176_s9 }
  0x14   : > { %s157_s26 = sshll.u32 %s1608_s1, 4  ;;  %s32_s10 = sadd.s32 1, %s1269_s16  ;;  %s158_s26 = int_to_ptr.hbm [resolvable:$true] %s157_s26 }
  0x15   : > { %1004 = dma.hbm_to_vmem [thread:$0]  (!%p1002_p10), %s158_s26, 3072, %s160_s29, [#allocation6], %s1276_s6, %s1276_s6, %s1277_s7  }
  0x16   : > { %1007 = dma.hbm_to_vmem [thread:$0]  (!%p1002_p10), %s175_s5, 48, %s177_s9, [#allocation6]  }
  0x17   : > { %s39_s11 = sadd.s32 1, %s1261_s14  ;;  %p34_p12 = scmp.ge.s32.totalorder %s32_s10, 2 }
  0x18   : > { %p46_p13 = scmp.ne.s32.totalorder %s1261_s14, %s1257_s13  ;;  %p47_p0 = scmp.eq.s32.totalorder %s1273_s17, 0 }
  0x19   : > { %p1018_p3 = scmp.lt.s32.totalorder %s1273_s17, 2  ;;  %s1620_s10 = smov (%p34_p12, %s32_s10), 0 }
  0x1a   : > { %p1381_p5 = por %p47_p0, %p46_p13  ;;  %p1387_p7 = por %p1342_p2, %p46_p13 }
  0x1b   : > { %s36_s24 = ssub.s32 %s1269_s16, %s1620_s10  ;;  %s187_s25 = sand.u32 1, %s1261_s14  }
  0x1c   : > { %p37_p9 = scmp.eq.s32.totalorder %s36_s24, 0  ;;  %s846_s26 = sshll.u32 %s187_s25, 6 }
  0x1d   : > { %s954_s28 = sshll.u32 %s1269_s16, 6  ;;  %s191_s7 = scalar_lea.vmem [#allocation2], %s846_s26 }
  0x1e   : > { %s1396_s29 = scalar_select %p37_p9, %s1261_s14, %s39_s11  }
  0x1f   : > { %s196_s5 = scalar_lea.hbm %s1599_s0, %s954_s28  ;;  %s199_s8 = sshll.u32 %s191_s7, 4  ;;  %s200_s8 = int_to_ptr.vmem [resolvable:$true] %s199_s8 }
  0x20   : > { %s197_s6 = sshll.u32 %s196_s5, 4  ;;  %p1009_p2 = pnand %p1018_p3, %p1381_p5  ;;  %s198_s6 = int_to_ptr.hbm [resolvable:$true] %s197_s6 }
  0x21   : > { %s188_s21 = scalar_lea.sflag [#allocation3], %s187_s25  ;;  %s1279_s9 = smov 128  }
  0x22   : > { %s1280_s1 = smov 8   ;;  %211 = sbr.rel (%p1361_p8) target bundleno = 585 (0x249), region = 32 }
  0x23   : > { %1011 = dma.hbm_to_vmem [thread:$0]  (!%p1009_p2), %s198_s6, 1024, %s200_s8, %s188_s21, %s1279_s9, %s1279_s9, %s1280_s1  }
  0x24   : > { %s1408_s11 = sand.u32 (!%p1361_p8), 1, %s1257_s13  }
  0x25   : > { %s850_s24 = sshll.u32 (!%p1361_p8), %s1408_s11, 6  ;;  %s214_s26 = scalar_lea.sflag (!%p1361_p8), [#allocation3], %s1408_s11 }
  0x26   : > { %s1412_s28 = scalar_lea.vmem (!%p1361_p8), [#allocation2], %s850_s24 }
  0x27   : > { %1240 = dma.done.wait (%p1348_p4), %s214_s26, 1024  }
  0x28   : > { %1242 = vsyncadd (%p1348_p4), %s214_s26, 4294966272 }
  0x29   : > { %1244 = dma.done.wait (%p1338_p1), [#allocation6], 3120  }
  0x2a   : > { %1246 = vsyncadd (%p1338_p1), [#allocation6], 4294964176  ;;  %v260_v0 = vld [vmem:[%s1412_s28 + $0x20] sm:$0xff]  ;;  %v258_v1 = vld [vmem:[%s1412_s28 + $0x10] sm:$0xff]  ;;  %v1281_v7 = vmov 128.0   ;;  %s987_s1 = smul.u32 192, %s1408_s11 }
  0x2b   : > { %v256_v2 = vld [vmem:[%s1412_s28] sm:$0xff]  ;;  %272 = vadd.xlane.f32.xlu2 %v260_v0  ;;  %268 = vadd.xlane.f32.xlu1 %v258_v1  ;;  %v261_v3 = vld [vmem:[%s1412_s28 + $0x28] sm:$0xff]  ;;  %v259_v4 = vld [vmem:[%s1412_s28 + $0x18] sm:$0xff]  ;;  %1079 = vrcp.f32 %v1281_v7  ;;  %s988_s22 = smul.u32 192, %s1265_s15  ;;  %s715_s4 = scalar_lea.sflag [#allocation4], %s1408_s11 }
  0x2c   : > { %264 = vadd.xlane.f32.xlu0 %v256_v2  ;;  %v257_v5 = vld [vmem:[%s1412_s28 + $0x8] sm:$0xff]  ;;  %v262_v6 = vld [vmem:[%s1412_s28 + $0x30] sm:$0xff]  ;;  %v1447_v30 = vld [vmem:[%s1412_s28 + $0x38] sm:$0xff]  ;;  %s1510_s20 = scalar_lea.vmem [#allocation8], %s987_s1  ;;  %s1207_s21 = scalar_lea.hbm %s1602_s3, 384 }
  0x2d   : > { %v939_v43 = vld [vmem:[#allocation5 + $0xa8] sm:$0xf]  ;;  %v977_v44 = vld [vmem:[#allocation5 + $0xb0] sm:$0xf0]  ;;  %v976_v45 = vld [vmem:[#allocation5 + $0xac] sm:$0xf]  ;;  %s729_s25 = scalar_lea.hbm %s1602_s3, %s988_s22 }
  0x2e   : > { %v940_v46 = vor.u32 %v977_v44, %v939_v43  ;;  %v941_v47 = vld [vmem:[#allocation5 + $0xb4] sm:$0xf0]  ;;  %v947_v48 = vld [vmem:[#allocation5 + $0xb0] sm:$0xf]  ;;  %v978_v49 = vld [vmem:[#allocation5 + $0xb8] sm:$0xf0] }
  0x2f   : > { %v944_v50 = vor.u32 %v976_v45, %v941_v47  ;;  %v948_v51 = vor.u32 %v978_v49, %v947_v48  ;;  %v927_v52 = vld [vmem:[#allocation5 + $0x90] sm:$0xf]  ;;  %v974_v53 = vld [vmem:[#allocation5 + $0x98] sm:$0xf0]  ;;  %v973_v54 = vld [vmem:[#allocation5 + $0x94] sm:$0xf] }
  0x30   : > { %603 = vmatpush.bf16.msra.mxu0 %v940_v46  ;;  %979 = vmatpush.bf16.msra.mxu3 %v940_v46  ;;  %v928_v55 = vor.u32 %v974_v53, %v927_v52  ;;  %v929_v56 = vld [vmem:[#allocation5 + $0x9c] sm:$0xf0]  ;;  %v935_v57 = vld [vmem:[#allocation5 + $0x98] sm:$0xf]  ;;  %v975_v58 = vld [vmem:[#allocation5 + $0xa0] sm:$0xf0] }
  0x31   : > { %v1080_v8 = vpop.eup %1079  ;;  %632 = vmatpush.bf16.msra.mxu1 %v944_v50  ;;  %661 = vmatpush.bf16.msra.mxu2 %v948_v51  ;;  %v932_v59 = vor.u32 %v973_v54, %v929_v56  ;;  %v936_v60 = vor.u32 %v975_v58, %v935_v57  ;;  %v915_v61 = vld [vmem:[#allocation5 + $0x78] sm:$0xf]  ;;  %v971_v62 = vld [vmem:[#allocation5 + $0x80] sm:$0xf0]  ;;  %v970_v63 = vld [vmem:[#allocation5 + $0x7c] sm:$0xf] }
  0x32   : > { %v281_v9 = vmul.f32 128.0, %v1080_v8  ;;  %vm285_vm0 = vweird.f32 %v1080_v8  ;;  %v968_v7 = vld [vmem:[#allocation5 + $0x68] sm:$0xf0]  ;;  %v959_v43 = vld [vmem:[#allocation5 + $0x20] sm:$0xf0]  ;;  %s730_s15 = sshll.u32 %s1510_s20, 4  ;;  %s731_s15 = int_to_ptr.vmem [resolvable:$true] %s730_s15 }
  0x33   : > { %274 = vadd.xlane.f32.xlu2 %v261_v3  ;;  %270 = vadd.xlane.f32.xlu1 %v259_v4  ;;  %v958_v44 = vld [vmem:[#allocation5 + $0x1c] sm:$0xf]  ;;  %v869_v46 = vld [vmem:[#allocation5 + $0x24] sm:$0xf0]  ;;  %v875_v47 = vld [vmem:[#allocation5 + $0x20] sm:$0xf] }
  0x34   : > { %266 = vadd.xlane.f32.xlu0 %v257_v5  ;;  %v282_v10 = vsub.f32 1.0, %v281_v9  ;;  %604 = vmatpush.bf16.msra.mxu0 %v928_v55  ;;  %v960_v48 = vld [vmem:[#allocation5 + $0x28] sm:$0xf0]  ;;  %v872_v49 = vor.u32 %v958_v44, %v869_v46  ;;  %v855_v51 = vld [vmem:[#allocation5] sm:$0xf]  ;;  %s732_s30 = sshll.u32 %s729_s25, 4  ;;  %s733_s30 = int_to_ptr.hbm [resolvable:$true] %s732_s30 }
  0x35   : > { %980 = vmatpush.bf16.msra.mxu3 %v928_v55  ;;  %633 = vmatpush.bf16.msra.mxu1 %v932_v59  ;;  %v876_v50 = vor.u32 %v960_v48, %v875_v47  ;;  %v956_v52 = vld [vmem:[#allocation5 + $0x8] sm:$0xf0]  ;;  %v955_v53 = vld [vmem:[#allocation5 + $0x4] sm:$0xf]  ;;  %v857_v55 = vld [vmem:[#allocation5 + $0xc] sm:$0xf0] }
  0x36   : > { %v283_v11 = vmul.f32 %v1080_v8, %v282_v10  ;;  %662 = vmatpush.bf16.msra.mxu2 %v936_v60  ;;  %v905_v10 = vld [vmem:[#allocation5 + $0x6c] sm:$0xf0]  ;;  %v856_v54 = vor.u32 %v956_v52, %v855_v51  ;;  %v863_v56 = vld [vmem:[#allocation5 + $0x8] sm:$0xf]  ;;  %v957_v57 = vld [vmem:[#allocation5 + $0x10] sm:$0xf0]  ;;  %v860_v59 = vor.u32 %v955_v53, %v857_v55 }
  0x37   : > { %v864_v60 = vor.u32 %v957_v57, %v863_v56  ;;  %s1201_s5 = sshra.s32 %s733_s30, 4  ;;  %s1202_s5 = int_to_ptr.hbm [resolvable:$true] %s1201_s5 }
  0x38   : > { %v284_v12 = vadd.f32 %v1080_v8, %v283_v11  ;;  %v911_v11 = vld [vmem:[#allocation5 + $0x68] sm:$0xf]  ;;  %s1203_s6 = scalar_lea.hbm %s1202_s5, 192  ;;  %p1208_p10 = scmp.lt.s32.totalorder %s1202_s5, %s1602_s3 }
  0x39   : > { %p1204_p1 = scmp.ne.s32.totalorder %s1202_s5, %s1203_s6  ;;  %p1209_p12 = scmp.lt.s32.totalorder %s1207_s21, %s1203_s6 }
  0x3a   : > { %v1429_v13 = vsel %vm285_vm0, %v1080_v8, %v284_v12  ;;  %v967_v8 = vld [vmem:[#allocation5 + $0x64] sm:$0xf]  ;;  %v969_v12 = vld [vmem:[#allocation5 + $0x70] sm:$0xf0] }
  0x3b   : > { %276 = vadd.xlane.f32.xlu2 %v262_v6  ;;  %p1205_p4 = pnand %p1204_p1, %p1387_p7  ;;  %p1210_p13 = por %p1209_p12, %p1208_p10 }
  0x3d   : > { %p1206_p8 = pneg %p1205_p4 }
  0x3f   : > { %p1211_p0 = pnand %p1210_p13, %p1206_p8 }
  0x9e   : > { %v273_v14 = vpop.xlane.xlu2 %272  ;;  %v269_v15 = vpop.xlane.xlu1 %268 }
  0x9f   : > { %v265_v16 = vpop.xlane.xlu0 %264  ;;  %v291_v26 = vmul.f32 %v1429_v13, %v273_v14  ;;  %v289_v27 = vmul.f32 %v1429_v13, %v269_v15  ;;  %v908_v14 = vor.u32 %v967_v8, %v905_v10  ;;  %v912_v15 = vor.u32 %v969_v12, %v911_v11 }
  0xa0   : > { %v287_v17 = vmul.f32 %v1429_v13, %v265_v16  ;;  %v891_v16 = vld [vmem:[#allocation5 + $0x48] sm:$0xf] }
  0xa1   : > { %v1451_v32 = vsub.f32 %v260_v0, %v291_v26  ;;  %v1453_v33 = vsub.f32 %v258_v1, %v289_v27  ;;  %v916_v0 = vor.u32 %v971_v62, %v915_v61  ;;  %v917_v1 = vld [vmem:[#allocation5 + $0x84] sm:$0xf0]  ;;  %v879_v27 = vld [vmem:[#allocation5 + $0x30] sm:$0xf] }
  0xa2   : > { %v1432_v18 = vsub.f32 %v256_v2, %v287_v17  ;;  %v923_v2 = vld [vmem:[#allocation5 + $0x80] sm:$0xf]  ;;  %v965_v17 = vld [vmem:[#allocation5 + $0x50] sm:$0xf0] }
  0xa3   : > { %v307_v38 = vmul.f32 %v1451_v32, %v1451_v32  ;;  %v305_v39 = vmul.f32 %v1453_v33, %v1453_v33  ;;  %605 = vmatpush.bf16.msra.mxu0 %v916_v0  ;;  %981 = vmatpush.bf16.msra.mxu3 %v916_v0 }
  0xa4   : > { %v303_v19 = vmul.f32 %v1432_v18, %v1432_v18 }
  0xa6   : > { %311 = vadd.xlane.f32.xlu0 %v303_v19  ;;  %v275_v20 = vpop.xlane.xlu2 %274  ;;  %v271_v21 = vpop.xlane.xlu1 %270  ;;  %v964_v19 = vld [vmem:[#allocation5 + $0x4c] sm:$0xf] }
  0xa7   : > { %v290_v22 = vmul.f32 %v1429_v13, %v271_v21  ;;  %v267_v23 = vpop.xlane.xlu0 %266  ;;  %v292_v37 = vmul.f32 %v1429_v13, %v275_v20  ;;  %v892_v20 = vor.u32 %v965_v17, %v891_v16  ;;  %v893_v21 = vld [vmem:[#allocation5 + $0x54] sm:$0xf0] }
  0xa8   : > { %v288_v24 = vmul.f32 %v1429_v13, %v267_v23  ;;  %v966_v23 = vld [vmem:[#allocation5 + $0x58] sm:$0xf0] }
  0xa9   : > { %v1438_v25 = vsub.f32 %v259_v4, %v290_v22  ;;  %v1466_v41 = vsub.f32 %v261_v3, %v292_v37  ;;  %v972_v3 = vld [vmem:[#allocation5 + $0x88] sm:$0xf0]  ;;  %v920_v4 = vor.u32 %v970_v63, %v917_v1  ;;  %v899_v22 = vld [vmem:[#allocation5 + $0x50] sm:$0xf]  ;;  %v887_v37 = vld [vmem:[#allocation5 + $0x38] sm:$0xf] }
  0xaa   : > { %v1442_v28 = vsub.f32 %v257_v5, %v288_v24  ;;  %v924_v5 = vor.u32 %v972_v3, %v923_v2  ;;  %v896_v24 = vor.u32 %v964_v19, %v893_v21  ;;  %v900_v26 = vor.u32 %v966_v23, %v899_v22 }
  0xab   : > { %v306_v29 = vmul.f32 %v1438_v25, %v1438_v25  ;;  %v308_v42 = vmul.f32 %v1466_v41, %v1466_v41  ;;  %634 = vmatpush.bf16.msra.mxu1 %v920_v4 }
  0xac   : > { %v304_v31 = vmul.f32 %v1442_v28, %v1442_v28  ;;  %663 = vmatpush.bf16.msra.mxu2 %v924_v5 }
  0xad   : > { %317 = vadd.xlane.f32.xlu2 %v306_v29  ;;  %v962_v29 = vld [vmem:[#allocation5 + $0x38] sm:$0xf0] }
  0xae   : > { %278 = vadd.xlane.f32.xlu0 %v1447_v30  ;;  %313 = vadd.xlane.f32.xlu1 %v304_v31  ;;  %v277_v34 = vpop.xlane.xlu2 %276  ;;  %v961_v31 = vld [vmem:[#allocation5 + $0x34] sm:$0xf] }
  0xaf   : > { %v293_v35 = vmul.f32 %v1429_v13, %v277_v34  ;;  %635 = vmatpush.bf16.msra.mxu1 %v908_v14  ;;  %v880_v34 = vor.u32 %v962_v29, %v879_v27 }
  0xb0   : > { %664 = vmatpush.bf16.msra.mxu2 %v912_v15 }
  0xb1   : > { %v1457_v36 = vsub.f32 %v262_v6, %v293_v35  ;;  %v903_v6 = vld [vmem:[#allocation5 + $0x60] sm:$0xf] }
  0xb2   : > { %v904_v9 = vor.u32 %v968_v7, %v903_v6  ;;  %v881_v35 = vld [vmem:[#allocation5 + $0x3c] sm:$0xf0] }
  0xb3   : > { %v309_v40 = vmul.f32 %v1457_v36, %v1457_v36  ;;  %636 = vmatpush.bf16.msra.mxu1 %v896_v24 }
  0xb4   : > { %606 = vmatpush.bf16.msra.mxu0 %v904_v9  ;;  %982 = vmatpush.bf16.msra.mxu3 %v904_v9 }
  0xb5   : > { %323 = vadd.xlane.f32.xlu2 %v309_v40  ;;  %665 = vmatpush.bf16.msra.mxu2 %v900_v26 }
  0xb6   : > { %319 = vadd.xlane.f32.xlu0 %v307_v38  ;;  %315 = vadd.xlane.f32.xlu1 %v305_v39  ;;  %v963_v38 = vld [vmem:[#allocation5 + $0x40] sm:$0xf0]  ;;  %v884_v39 = vor.u32 %v961_v31, %v881_v35 }
  0xb7   : > { %v888_v40 = vor.u32 %v963_v38, %v887_v37 }
  0xb8   : > { %607 = vmatpush.bf16.msra.mxu0 %v892_v20  ;;  %983 = vmatpush.bf16.msra.mxu3 %v892_v20 }
  0xb9   : > { %637 = vmatpush.bf16.msra.mxu1 %v884_v39  ;;  %666 = vmatpush.bf16.msra.mxu2 %v888_v40 }
  0xbc   : > { %608 = vmatpush.bf16.msra.mxu0 %v880_v34  ;;  %984 = vmatpush.bf16.msra.mxu3 %v880_v34 }
  0xbd   : > { %638 = vmatpush.bf16.msra.mxu1 %v872_v49  ;;  %667 = vmatpush.bf16.msra.mxu2 %v876_v50 }
  0xbe   : > { %321 = vadd.xlane.f32.xlu1 %v308_v42  ;;  %v867_v42 = vld [vmem:[#allocation5 + $0x18] sm:$0xf] }
  0xbf   : > { %v868_v45 = vor.u32 %v959_v43, %v867_v42 }
  0xc1   : > { %609 = vmatpush.bf16.msra.mxu0 %v868_v45  ;;  %985 = vmatpush.bf16.msra.mxu3 %v868_v45 }
  0xc2   : > { %639 = vmatpush.bf16.msra.mxu1 %v860_v59  ;;  %668 = vmatpush.bf16.msra.mxu2 %v864_v60 }
  0xc5   : > { %610 = vmatpush.bf16.msra.mxu0 %v856_v54  ;;  %986 = vmatpush.bf16.msra.mxu3 %v856_v54 }
 0x119   : > { %v312_v58 = vpop.xlane.xlu0 %311 }
 0x11a   : > { %v327_v61 = vmul.f32 %v312_v58, %v1429_v13 }
 0x11c   : > { %v335_v62 = vadd.f32 1e-05, %v327_v61 }
 0x11e   : > { %1081 = vrsqrt.f32 %v335_v62  ;;  %vm349_vm4 = vweird.f32 %v335_v62 }
 0x120   : > { %v318_v63 = vpop.xlane.xlu2 %317 }
 0x121   : > { %v330_v0 = vmul.f32 %v318_v63, %v1429_v13  ;;  %v314_v1 = vpop.xlane.xlu1 %313  ;;  %v279_v2 = vpop.xlane.xlu0 %278 }
 0x122   : > { %v328_v3 = vmul.f32 %v314_v1, %v1429_v13  ;;  %v294_v4 = vmul.f32 %v1429_v13, %v279_v2 }
 0x123   : > { %v338_v5 = vadd.f32 1e-05, %v330_v0 }
 0x124   : > { %v1082_v6 = vpop.eup %1081  ;;  %v336_v7 = vadd.f32 1e-05, %v328_v3  ;;  %v1475_v8 = vsub.f32 %v1447_v30, %v294_v4 }
 0x125   : > { %v344_v9 = vmul.f32 %v1082_v6, %v335_v62  ;;  %1083 = vrsqrt.f32 %v338_v5  ;;  %vm350_vm1 = vweird.f32 %v1082_v6  ;;  %vm379_vm7 = vweird.f32 %v338_v5 }
 0x126   : > { %1085 = vrsqrt.f32 %v336_v7  ;;  %v310_v10 = vmul.f32 %v1475_v8, %v1475_v8  ;;  %vm359_vm2 = vweird.f32 %v336_v7  ;;  %vm1485_vm5 = vmor %vm349_vm4, %vm350_vm1 }
 0x127   : > { %v345_v11 = vmul.f32 %v1082_v6, %v344_v9 }
 0x128   : > { %325 = vadd.xlane.f32.xlu0 %v310_v10 }
 0x129   : > { %v346_v12 = vmul.f32 0.5, %v345_v11  ;;  %v316_v14 = vpop.xlane.xlu1 %315  ;;  %v320_v15 = vpop.xlane.xlu0 %319 }
 0x12a   : > { %v329_v16 = vmul.f32 %v316_v14, %v1429_v13  ;;  %v331_v17 = vmul.f32 %v320_v15, %v1429_v13  ;;  %v324_v11 = vpop.xlane.xlu2 %323 }
 0x12b   : > { %v1084_v19 = vpop.eup %1083  ;;  %v347_v23 = vsub.f32 1.5, %v346_v12  ;;  %v333_v12 = vmul.f32 %v324_v11, %v1429_v13 }
 0x12c   : > { %v1086_v20 = vpop.eup %1085  ;;  %v374_v21 = vmul.f32 %v1084_v19, %v338_v5  ;;  %v337_v30 = vadd.f32 1e-05, %v329_v16  ;;  %v1481_v22 = vadd.f32 1e-05, %v331_v17  ;;  %vm380_vm8 = vweird.f32 %v1084_v19 }
 0x12d   : > { %v354_v24 = vmul.f32 %v1086_v20, %v336_v7  ;;  %v348_v29 = vmul.f32 %v1082_v6, %v347_v23  ;;  %vm360_vm3 = vweird.f32 %v1086_v20  ;;  %vm381_vm11 = vmor %vm379_vm7, %vm380_vm8  ;;  %v341_v14 = vadd.f32 1e-05, %v333_v12 }
 0x12e   : > { %v375_v26 = vmul.f32 %v1084_v19, %v374_v21  ;;  %1087 = vrsqrt.f32 %v337_v30  ;;  %vm361_vm6 = vmor %vm359_vm2, %vm360_vm3  ;;  %vm369_vm9 = vweird.f32 %v337_v30  ;;  %vm389_vm15 = vweird.f32 %v1481_v22 }
 0x12f   : > { %v355_v27 = vmul.f32 %v1086_v20, %v354_v24  ;;  %1089 = vrsqrt.f32 %v1481_v22  ;;  %v352_v46 = vsel %vm1485_vm5, %v1082_v6, %v348_v29  ;;  %vm409_vm3 = vweird.f32 %v341_v14 }
 0x130   : > { %v376_v31 = vmul.f32 0.5, %v375_v26  ;;  %v423_v50 = vmul.f32 %v352_v46, %v1432_v18 }
 0x131   : > { %v356_v34 = vmul.f32 0.5, %v355_v27  ;;  %v322_v35 = vpop.xlane.xlu1 %321 }
 0x132   : > { %v332_v37 = vmul.f32 %v322_v35, %v1429_v13  ;;  %v377_v43 = vsub.f32 1.5, %v376_v31 }
 0x133   : > { %v357_v39 = vsub.f32 1.5, %v356_v34 }
 0x134   : > { %v1088_v40 = vpop.eup %1087  ;;  %v340_v42 = vadd.f32 1e-05, %v332_v37  ;;  %v378_v52 = vmul.f32 %v1084_v19, %v377_v43  ;;  %v467_v37 = vld [vmem:[#allocation7] sm:$0x7] }
 0x135   : > { %v358_v44 = vmul.f32 %v1086_v20, %v357_v39  ;;  %v364_v45 = vmul.f32 %v1088_v40, %v337_v30  ;;  %v1090_v47 = vpop.eup %1089  ;;  %vm370_vm10 = vweird.f32 %v1088_v40  ;;  %v1504_v39 = vperm.slane %v467_v37, 0 }
 0x136   : > { %1091 = vrsqrt.f32 %v340_v42  ;;  %v384_v54 = vmul.f32 %v1090_v47, %v1481_v22  ;;  %vm371_vm12 = vmor %vm369_vm9, %vm370_vm10  ;;  %v382_v61 = vsel %vm381_vm11, %v1084_v19, %v378_v52  ;;  %vm399_vm13 = vweird.f32 %v340_v42 }
 0x137   : > { %v365_v48 = vmul.f32 %v1088_v40, %v364_v45  ;;  %v362_v49 = vsel %vm361_vm6, %v1086_v20, %v358_v44  ;;  %v426_v63 = vmul.f32 %v382_v61, %v1438_v25  ;;  %vm390_vm0 = vweird.f32 %v1090_v47 }
 0x138   : > { %v424_v51 = vmul.f32 %v362_v49, %v1442_v28  ;;  %v385_v59 = vmul.f32 %v1090_v47, %v384_v54  ;;  %vm391_vm2 = vmor %vm389_vm15, %vm390_vm0  ;;  %1093 = vrsqrt.f32 %v341_v14 }
 0x139   : > { %v366_v53 = vmul.f32 0.5, %v365_v48 }
 0x13a   : > { %v431_v55 = vpack.c.bf16 %v424_v51, %v423_v50  ;;  %v386_v0 = vmul.f32 0.5, %v385_v59 }
 0x13b   : > { %v367_v56 = vsub.f32 1.5, %v366_v53 }
 0x13c   : > { %v1092_v57 = vpop.eup %1091  ;;  %611 = vmatmul.bf16.vlgmr.msra.gmra.mxu0 %v431_v55  ;;  %640 = vmatmul.bf16.vlgmr.msra.gmra.mxu1 %v431_v55  ;;  %v387_v4 = vsub.f32 1.5, %v386_v0 }
 0x13d   : > { %v368_v58 = vmul.f32 %v1088_v40, %v367_v56  ;;  %v394_v60 = vmul.f32 %v1092_v57, %v340_v42  ;;  %669 = vmatmul.bf16.vlgmr.msra.gmra.mxu2 %v431_v55  ;;  %vm400_vm14 = vweird.f32 %v1092_v57 }
 0x13e   : > { %vm401_vm1 = vmor %vm399_vm13, %vm400_vm14  ;;  %v388_v6 = vmul.f32 %v1090_v47, %v387_v4  ;;  %v1094_v15 = vpop.eup %1093 }
 0x13f   : > { %v395_v18 = vmul.f32 %v1092_v57, %v394_v60  ;;  %v372_v62 = vsel %vm371_vm12, %v1088_v40, %v368_v58  ;;  %v404_v16 = vmul.f32 %v1094_v15, %v341_v14  ;;  %vm410_vm4 = vweird.f32 %v1094_v15 }
 0x140   : > { %v425_v28 = vmul.f32 %v372_v62, %v1453_v33  ;;  %v392_v33 = vsel %vm391_vm2, %v1090_v47, %v388_v6  ;;  %vm411_vm5 = vmor %vm409_vm3, %vm410_vm4  ;;  %v1506_v40 = vperm.slane %v467_v37, 1 }
 0x141   : > { %v396_v1 = vmul.f32 0.5, %v395_v18  ;;  %v427_v9 = vmul.f32 %v392_v33, %v1451_v32  ;;  %v405_v21 = vmul.f32 %v1094_v15, %v404_v16 }
 0x142   : > { %v432_v2 = vpack.c.bf16 %v426_v63, %v425_v28 }
 0x143   : > { %v397_v3 = vsub.f32 1.5, %v396_v1 }
 0x144   : > { %616 = vmatmul.bf16.vlgmr.msra.gmra.mxu3 %v432_v2 }
 0x145   : > { %v398_v5 = vmul.f32 %v1092_v57, %v397_v3 }
 0x147   : > { %v402_v7 = vsel %vm401_vm1, %v1092_v57, %v398_v5 }
 0x148   : > { %v428_v25 = vmul.f32 %v402_v7, %v1466_v41  ;;  %v406_v41 = vmul.f32 0.5, %v405_v21 }
 0x14a   : > { %v433_v10 = vpack.c.bf16 %v428_v25, %v427_v9  ;;  %v407_v32 = vsub.f32 1.5, %v406_v41 }
 0x14c   : > { %645 = vmatmul.bf16.gmra.mxu1 %v432_v2  ;;  %v408_v24 = vmul.f32 %v1094_v15, %v407_v32 }
 0x14d   : > { %674 = vmatmul.bf16.gmra.mxu2 %v432_v2 }
 0x14e   : > { %v412_v31 = vsel %vm411_vm5, %v1094_v15, %v408_v24 }
 0x14f   : > { %v429_v34 = vmul.f32 %v412_v31, %v1457_v36  ;;  %v1514_v36 = vperm.slane %v467_v37, 2 }
 0x154   : > { %621 = vmatmul.bf16.gmra.mxu3 %v433_v10 }
 0x15c   : > { %650 = vmatmul.bf16.gmra.mxu1 %v433_v10 }
 0x15d   : > { %679 = vmatmul.bf16.gmra.mxu2 %v433_v10 }
 0x19b   : > { %v326_v17 = vpop.xlane.xlu0 %325 }
 0x19c   : > { %v334_v19 = vmul.f32 %v326_v17, %v1429_v13 }
 0x19e   : > { %v342_v20 = vadd.f32 1e-05, %v334_v19 }
 0x1a0   : > { %1095 = vrsqrt.f32 %v342_v20  ;;  %vm419_vm7 = vweird.f32 %v342_v20 }
 0x1a6   : > { %v1096_v30 = vpop.eup %1095 }
 0x1a7   : > { %v414_v22 = vmul.f32 %v1096_v30, %v342_v20  ;;  %vm420_vm6 = vweird.f32 %v1096_v30 }
 0x1a8   : > { %vm421_vm8 = vmor %vm419_vm7, %vm420_vm6 }
 0x1a9   : > { %v415_v23 = vmul.f32 %v1096_v30, %v414_v22 }
 0x1ab   : > { %v416_v26 = vmul.f32 0.5, %v415_v23 }
 0x1ad   : > { %v417_v27 = vsub.f32 1.5, %v416_v26 }
 0x1af   : > { %v418_v29 = vmul.f32 %v1096_v30, %v417_v27 }
 0x1b1   : > { %v422_v13 = vsel %vm421_vm8, %v1096_v30, %v418_v29 }
 0x1b2   : > { %v430_v35 = vmul.f32 %v422_v13, %v1475_v8 }
 0x1b4   : > { %v434_v38 = vpack.c.bf16 %v430_v35, %v429_v34 }
 0x1b6   : > { %626 = vmatmul.bf16.gmra.mxu3 %v434_v38  ;;  %655 = vmatmul.bf16.gmra.mxu1 %v434_v38 }
 0x1b7   : > { %684 = vmatmul.bf16.gmra.mxu2 %v434_v38 }
 0x1b9   : > { %v612_v42 = vpop.f32.mrf.mxu0  ;;  %v641_v43 = vpop.f32.mrf.mxu1 }
 0x1ba   : > { %v613_v44 = vadd.f32 %v612_v42, %v1504_v39  ;;  %v642_v45 = vadd.f32 %v641_v43, %v1506_v40 }
 0x1bc   : > { %690 = vst [vmem:[%s1510_s20] sm:$0xff] %v613_v44 }
 0x1bd   : > { %691 = vst [vmem:[%s1510_s20 + $0x8] sm:$0xff] %v642_v45 }
 0x1c0   : > { %v670_v8 = vpop.f32.mrf.mxu2 }
 0x1c1   : > { %v671_v46 = vadd.f32 %v670_v8, %v1514_v36  ;;  %v614_v47 = vpop.f32.mrf.mxu0  ;;  %v643_v48 = vpop.f32.mrf.mxu1 }
 0x1c2   : > { %v615_v49 = vadd.f32 %v614_v47, %v1504_v39  ;;  %v644_v50 = vadd.f32 %v643_v48, %v1506_v40 }
 0x1c3   : > { %692 = vst [vmem:[%s1510_s20 + $0x10] sm:$0xff] %v671_v46 }
 0x1c4   : > { %693 = vst [vmem:[%s1510_s20 + $0x18] sm:$0xff] %v615_v49 }
 0x1c5   : > { %694 = vst [vmem:[%s1510_s20 + $0x20] sm:$0xff] %v644_v50 }
 0x1c7   : > { %v617_v51 = vpop.f32.mrf.mxu3 }
 0x1c8   : > { %v618_v52 = vadd.f32 %v617_v51, %v1504_v39  ;;  %v672_v53 = vpop.f32.mrf.mxu2 }
 0x1c9   : > { %v673_v54 = vadd.f32 %v672_v53, %v1514_v36  ;;  %v646_v55 = vpop.f32.mrf.mxu1 }
 0x1ca   : > { %696 = vst [vmem:[%s1510_s20 + $0x30] sm:$0xff] %v618_v52  ;;  %v647_v56 = vadd.f32 %v646_v55, %v1506_v40 }
 0x1cb   : > { %695 = vst [vmem:[%s1510_s20 + $0x28] sm:$0xff] %v673_v54 }
 0x1cc   : > { %697 = vst [vmem:[%s1510_s20 + $0x38] sm:$0xff] %v647_v56 }
 0x1cf   : > { %v619_v57 = vpop.f32.mrf.mxu3 }
 0x1d0   : > { %v620_v58 = vadd.f32 %v619_v57, %v1504_v39  ;;  %v675_v59 = vpop.f32.mrf.mxu2 }
 0x1d1   : > { %v676_v60 = vadd.f32 %v675_v59, %v1514_v36  ;;  %v648_v61 = vpop.f32.mrf.mxu1 }
 0x1d2   : > { %699 = vst [vmem:[%s1510_s20 + $0x48] sm:$0xff] %v620_v58  ;;  %v649_v18 = vadd.f32 %v648_v61, %v1506_v40 }
 0x1d3   : > { %698 = vst [vmem:[%s1510_s20 + $0x40] sm:$0xff] %v676_v60 }
 0x1d4   : > { %700 = vst [vmem:[%s1510_s20 + $0x50] sm:$0xff] %v649_v18 }
 0x1d7   : > { %v622_v62 = vpop.f32.mrf.mxu3 }
 0x1d8   : > { %v623_v28 = vadd.f32 %v622_v62, %v1504_v39  ;;  %v677_v63 = vpop.f32.mrf.mxu2 }
 0x1d9   : > { %v678_v0 = vadd.f32 %v677_v63, %v1514_v36  ;;  %v651_v1 = vpop.f32.mrf.mxu1 }
 0x1da   : > { %702 = vst [vmem:[%s1510_s20 + $0x60] sm:$0xff] %v623_v28  ;;  %v652_v2 = vadd.f32 %v651_v1, %v1506_v40 }
 0x1db   : > { %701 = vst [vmem:[%s1510_s20 + $0x58] sm:$0xff] %v678_v0 }
 0x1dc   : > { %703 = vst [vmem:[%s1510_s20 + $0x68] sm:$0xff] %v652_v2 }
 0x1df   : > { %v624_v3 = vpop.f32.mrf.mxu3 }
 0x1e0   : > { %v625_v4 = vadd.f32 %v624_v3, %v1504_v39  ;;  %v680_v5 = vpop.f32.mrf.mxu2 }
 0x1e1   : > { %v681_v6 = vadd.f32 %v680_v5, %v1514_v36  ;;  %v653_v7 = vpop.f32.mrf.mxu1 }
 0x1e2   : > { %705 = vst [vmem:[%s1510_s20 + $0x78] sm:$0xff] %v625_v4  ;;  %v654_v33 = vadd.f32 %v653_v7, %v1506_v40 }
 0x1e3   : > { %704 = vst [vmem:[%s1510_s20 + $0x70] sm:$0xff] %v681_v6 }
 0x1e4   : > { %706 = vst [vmem:[%s1510_s20 + $0x80] sm:$0xff] %v654_v33 }
 0x1e8   : > { %v682_v25 = vpop.f32.mrf.mxu2 }
 0x1e9   : > { %v683_v9 = vadd.f32 %v682_v25, %v1514_v36 }
 0x1eb   : > { %707 = vst [vmem:[%s1510_s20 + $0x88] sm:$0xff] %v683_v9 }
 0x233   : > { %v656_v10 = vpop.f32.mrf.mxu1 }
 0x234   : > { %v657_v11 = vadd.f32 %v656_v10, %v1506_v40 }
 0x236   : > { %709 = vst [vmem:[%s1510_s20 + $0x98] sm:$0xff] %v657_v11 }
 0x239   : > { %v627_v12 = vpop.f32.mrf.mxu3 }
 0x23a   : > { %v628_v14 = vadd.f32 %v627_v12, %v1504_v39  ;;  %v685_v15 = vpop.f32.mrf.mxu2 }
 0x23b   : > { %v686_v16 = vadd.f32 %v685_v15, %v1514_v36  ;;  %v658_v17 = vpop.f32.mrf.mxu1 }
 0x23c   : > { %708 = vst [vmem:[%s1510_s20 + $0x90] sm:$0xff] %v628_v14  ;;  %v659_v19 = vadd.f32 %v658_v17, %v1506_v40 }
 0x23d   : > { %710 = vst [vmem:[%s1510_s20 + $0xa0] sm:$0xff] %v686_v16 }
 0x23e   : > { %712 = vst [vmem:[%s1510_s20 + $0xb0] sm:$0xff] %v659_v19 }
 0x241   : > { %v629_v20 = vpop.f32.mrf.mxu3 }
 0x242   : > { %v630_v21 = vadd.f32 %v629_v20, %v1504_v39  ;;  %v687_v41 = vpop.f32.mrf.mxu2 }
 0x243   : > { %v688_v30 = vadd.f32 %v687_v41, %v1514_v36 }
 0x244   : > { %711 = vst [vmem:[%s1510_s20 + $0xa8] sm:$0xff] %v630_v21 }
 0x245   : > { %713 = vst [vmem:[%s1510_s20 + $0xb8] sm:$0xff] %v688_v30 }
 0x246   : > { %1214 = shalt.err (!%p1211_p0)
}
 0x247   : > { %s1282_s11 = smov 384   ;;  %s1283_s26 = smov 24  }
 0x248   : > { %999 = dma.vmem_to_hbm [thread:$0]  (%p1387_p7), %s731_s15, 3072, %s733_s30, %s715_s4, %s1282_s11, %s1282_s11, %s1283_s26  }
 0x249 PF: > { %s747_s28 = sand.u32 1, %s1253_s12   ;;  %p1013_p3 = pnand %p845_p11, %p1353_p6 }
 0x24a   : > { %s748_s1 = scalar_lea.sflag [#allocation4], %s747_s28 }
 0x24b   : > { %p1014_p5 = pneg %p1013_p3 }
 0x24d   : > { %1248 = dma.done.wait (%p1014_p5), %s748_s1, 3072  }
 0x24e   : > { %1250 = vsyncadd (%p1014_p5), %s748_s1, 4294964224  ;;  %s20_s17 = sadd.s32 1, %s1273_s17   ;;  %s1614_s12 = smov %s1257_s13 }
 0x24f   : > { %p17_p9 = scmp.ge.s32.totalorder %s20_s17, 4   ;;  %s1615_s13 = smov %s1261_s14 }
 0x250   : > { %s1616_s14 = smov %s1396_s29  ;;  %s1617_s15 = smov %s1269_s16 }
 0x251   : > { %s1618_s16 = smov %s1620_s10  ;;  %19 = sbr.rel (!%p17_p9) target bundleno = 9 (0x9), region = 87 }
 0x256   :  { %754 = vsyncpa [#allocation3], 1 }
 0x257   :  { %756 = vsyncpa [#allocation3 + $0x1], 1 }
 0x258   :  { %757 = vsyncpa [#allocation6], 1 }
 0x259   :  { %758 = vsyncpa [#allocation4], 1 }
 0x25a   :  { %760 = vsyncpa [#allocation4 + $0x1], 1 }

// kernel: tpu_custom_call.1
= control target key start
LH: loop header
LB: loop body
LE: loop exit
PB: predicated region body
PF: predicated region fallthrough
CT: control target
= control target key end

     0   :  { %s1599_s0 = inlined_call_operand.hbm [shape: f32[128,128], index: 0, kind: input, shape index: {}]   ;;  %s1600_s1 = inlined_call_operand.hbm [shape: bf16[128,384], index: 1, kind: input, shape index: {}]   ;;  %s1601_s2 = inlined_call_operand.hbm [shape: f32[1,384], index: 2, kind: input, shape index: {}]   ;;  %s1602_s3 = inlined_call_operand.hbm [shape: f32[128,384], index: 3, kind: output, shape index: {}]  }
   0x1   :  { %1603 = sst [smem:[#allocation12_spill]] %s1600_s1 }
   0x2   :  { %8 = vsyncpa [#allocation3], 0 }
   0x3   :  { %10 = vsyncpa [#allocation3 + $0x1], 0 }
   0x4   :  { %11 = vsyncpa [#allocation6], 0 }
   0x5   :  { %12 = vsyncpa [#allocation4], 0 }
   0x6   :  { %14 = vsyncpa [#allocation4 + $0x1], 0  ;;  %s1304_s12 = smov 0   ;;  %s1306_s13 = smov 0  }
   0x7   :  { %s1308_s14 = smov 0   ;;  %s1310_s15 = smov 0  }
   0x8   :  { %s1312_s16 = smov 0   ;;  %s1314_s17 = smov 0  }
   0x9 LB: > { %s840_s18 = sadd.s32 4294967295, %s1273_s17   ;;  %s841_s19 = sadd.s32 4294967294, %s1273_s17   ;;  %s1273_s17 = sphi %s1314_s17, %s20_s17   ;;  %s1269_s16 = sphi %s1312_s16, %s1618_s16   ;;  %s1265_s15 = sphi %s1310_s15, %s1617_s15   ;;  %s1261_s14 = sphi %s1308_s14, %s1616_s14   ;;  %s1257_s13 = sphi %s1306_s13, %s1615_s13   ;;  %s1253_s12 = sphi %s1304_s12, %s1614_s12  }
   0xa   : > { %p52_p0 = scmp.ne.s32.totalorder %s1257_s13, %s1253_s12  ;;  %p1338_p1 = scmp.eq.s32.totalorder %s840_s18, 0 }
   0xb   : > { %p1342_p2 = scmp.eq.s32.totalorder %s840_s18, 1  ;;  %p136_p3 = scmp.eq.s32.totalorder %s841_s19, 1 }
   0xc   : > { %p1348_p4 = por %p1338_p1, %p52_p0  ;;  %p842_p5 = scmp.ge.s32.totalorder %s1273_s17, 1 }
   0xd   : > { %p1353_p6 = por %p136_p3, %p52_p0  ;;  %p143_p7 = scmp.lt.s32.totalorder %s1273_s17, 3 }
   0xe   : > { %s1608_s1 = sld [smem:[#allocation12_spill]]  ;;  %s1275_s28 = smov [#allocation5]  }
   0xf   : > { %p1361_p8 = pnand %p842_p5, %p143_p7  ;;  %s159_s29 = sshll.u32 %s1275_s28, 4  ;;  %s160_s29 = int_to_ptr.vmem [resolvable:$true] %s159_s29 }
  0x10   : > { %p845_p11 = scmp.ge.s32.totalorder %s1273_s17, 2  ;;  %s174_s5 = sshll.u32 %s1601_s2, 4  ;;  %s175_s5 = int_to_ptr.hbm [resolvable:$true] %s174_s5 }
  0x11   : > { %p1001_p9 = pneg %p1361_p8  ;;  %s1276_s6 = smov 192  }
  0x12   : > { %s1277_s7 = smov 12   ;;  %s1278_s8 = smov [#allocation7]  }
  0x13   : > { %p1002_p10 = pnand %p1001_p9, %p1338_p1  ;;  %s176_s9 = sshll.u32 %s1278_s8, 4  ;;  %s177_s9 = int_to_ptr.vmem [resolvable:$true] %s176_s9 }
  0x14   : > { %s157_s26 = sshll.u32 %s1608_s1, 4  ;;  %s32_s10 = sadd.s32 1, %s1269_s16  ;;  %s158_s26 = int_to_ptr.hbm [resolvable:$true] %s157_s26 }
  0x15   : > { %1004 = dma.hbm_to_vmem [thread:$0]  (!%p1002_p10), %s158_s26, 3072, %s160_s29, [#allocation6], %s1276_s6, %s1276_s6, %s1277_s7  }
  0x16   : > { %1007 = dma.hbm_to_vmem [thread:$0]  (!%p1002_p10), %s175_s5, 48, %s177_s9, [#allocation6]  }
  0x17   : > { %s39_s11 = sadd.s32 1, %s1261_s14  ;;  %p34_p12 = scmp.ge.s32.totalorder %s32_s10, 2 }
  0x18   : > { %p46_p13 = scmp.ne.s32.totalorder %s1261_s14, %s1257_s13  ;;  %p47_p0 = scmp.eq.s32.totalorder %s1273_s17, 0 }
  0x19   : > { %p1018_p3 = scmp.lt.s32.totalorder %s1273_s17, 2  ;;  %s1620_s10 = smov (%p34_p12, %s32_s10), 0 }
  0x1a   : > { %p1381_p5 = por %p47_p0, %p46_p13  ;;  %p1387_p7 = por %p1342_p2, %p46_p13 }
  0x1b   : > { %s36_s24 = ssub.s32 %s1269_s16, %s1620_s10  ;;  %s187_s25 = sand.u32 1, %s1261_s14  }
  0x1c   : > { %p37_p9 = scmp.eq.s32.totalorder %s36_s24, 0  ;;  %s846_s26 = sshll.u32 %s187_s25, 6 }
  0x1d   : > { %s954_s28 = sshll.u32 %s1269_s16, 6  ;;  %s191_s7 = scalar_lea.vmem [#allocation2], %s846_s26 }
  0x1e   : > { %s1396_s29 = scalar_select %p37_p9, %s1261_s14, %s39_s11  }
  0x1f   : > { %s196_s5 = scalar_lea.hbm %s1599_s0, %s954_s28  ;;  %s199_s8 = sshll.u32 %s191_s7, 4  ;;  %s200_s8 = int_to_ptr.vmem [resolvable:$true] %s199_s8 }
  0x20   : > { %s197_s6 = sshll.u32 %s196_s5, 4  ;;  %p1009_p2 = pnand %p1018_p3, %p1381_p5  ;;  %s198_s6 = int_to_ptr.hbm [resolvable:$true] %s197_s6 }
  0x21   : > { %s188_s21 = scalar_lea.sflag [#allocation3], %s187_s25  ;;  %s1279_s9 = smov 128  }
  0x22   : > { %s1280_s1 = smov 8   ;;  %211 = sbr.rel (%p1361_p8) target bundleno = 585 (0x249), region = 32 }
  0x23   : > { %1011 = dma.hbm_to_vmem [thread:$0]  (!%p1009_p2), %s198_s6, 1024, %s200_s8, %s188_s21, %s1279_s9, %s1279_s9, %s1280_s1  }
  0x24   : > { %s1408_s11 = sand.u32 (!%p1361_p8), 1, %s1257_s13  }
  0x25   : > { %s850_s24 = sshll.u32 (!%p1361_p8), %s1408_s11, 6  ;;  %s214_s26 = scalar_lea.sflag (!%p1361_p8), [#allocation3], %s1408_s11 }
  0x26   : > { %s1412_s28 = scalar_lea.vmem (!%p1361_p8), [#allocation2], %s850_s24 }
  0x27   : > { %1240 = dma.done.wait (%p1348_p4), %s214_s26, 1024  }
  0x28   : > { %1242 = vsyncadd (%p1348_p4), %s214_s26, 4294966272 }
  0x29   : > { %1244 = dma.done.wait (%p1338_p1), [#allocation6], 3120  }
  0x2a   : > { %1246 = vsyncadd (%p1338_p1), [#allocation6], 4294964176  ;;  %v260_v0 = vld [vmem:[%s1412_s28 + $0x20] sm:$0xff]  ;;  %v258_v1 = vld [vmem:[%s1412_s28 + $0x10] sm:$0xff]  ;;  %v1281_v7 = vmov 128.0   ;;  %s987_s1 = smul.u32 192, %s1408_s11 }
  0x2b   : > { %v256_v2 = vld [vmem:[%s1412_s28] sm:$0xff]  ;;  %272 = vadd.xlane.f32.xlu2 %v260_v0  ;;  %268 = vadd.xlane.f32.xlu1 %v258_v1  ;;  %v261_v3 = vld [vmem:[%s1412_s28 + $0x28] sm:$0xff]  ;;  %v259_v4 = vld [vmem:[%s1412_s28 + $0x18] sm:$0xff]  ;;  %1079 = vrcp.f32 %v1281_v7  ;;  %s988_s22 = smul.u32 192, %s1265_s15  ;;  %s715_s4 = scalar_lea.sflag [#allocation4], %s1408_s11 }
  0x2c   : > { %264 = vadd.xlane.f32.xlu0 %v256_v2  ;;  %v257_v5 = vld [vmem:[%s1412_s28 + $0x8] sm:$0xff]  ;;  %v262_v6 = vld [vmem:[%s1412_s28 + $0x30] sm:$0xff]  ;;  %v1447_v30 = vld [vmem:[%s1412_s28 + $0x38] sm:$0xff]  ;;  %s1510_s20 = scalar_lea.vmem [#allocation8], %s987_s1  ;;  %s1207_s21 = scalar_lea.hbm %s1602_s3, 384 }
  0x2d   : > { %v939_v43 = vld [vmem:[#allocation5 + $0xa8] sm:$0xf]  ;;  %v977_v44 = vld [vmem:[#allocation5 + $0xb0] sm:$0xf0]  ;;  %v976_v45 = vld [vmem:[#allocation5 + $0xac] sm:$0xf]  ;;  %s729_s25 = scalar_lea.hbm %s1602_s3, %s988_s22 }
  0x2e   : > { %v940_v46 = vor.u32 %v977_v44, %v939_v43  ;;  %v941_v47 = vld [vmem:[#allocation5 + $0xb4] sm:$0xf0]  ;;  %v947_v48 = vld [vmem:[#allocation5 + $0xb0] sm:$0xf]  ;;  %v978_v49 = vld [vmem:[#allocation5 + $0xb8] sm:$0xf0] }
  0x2f   : > { %v944_v50 = vor.u32 %v976_v45, %v941_v47  ;;  %v948_v51 = vor.u32 %v978_v49, %v947_v48  ;;  %v927_v52 = vld [vmem:[#allocation5 + $0x90] sm:$0xf]  ;;  %v974_v53 = vld [vmem:[#allocation5 + $0x98] sm:$0xf0]  ;;  %v973_v54 = vld [vmem:[#allocation5 + $0x94] sm:$0xf] }
  0x30   : > { %603 = vmatpush.bf16.msra.mxu0 %v940_v46  ;;  %979 = vmatpush.bf16.msra.mxu3 %v940_v46  ;;  %v928_v55 = vor.u32 %v974_v53, %v927_v52  ;;  %v929_v56 = vld [vmem:[#allocation5 + $0x9c] sm:$0xf0]  ;;  %v935_v57 = vld [vmem:[#allocation5 + $0x98] sm:$0xf]  ;;  %v975_v58 = vld [vmem:[#allocation5 + $0xa0] sm:$0xf0] }
  0x31   : > { %v1080_v8 = vpop.eup %1079  ;;  %632 = vmatpush.bf16.msra.mxu1 %v944_v50  ;;  %661 = vmatpush.bf16.msra.mxu2 %v948_v51  ;;  %v932_v59 = vor.u32 %v973_v54, %v929_v56  ;;  %v936_v60 = vor.u32 %v975_v58, %v935_v57  ;;  %v915_v61 = vld [vmem:[#allocation5 + $0x78] sm:$0xf]  ;;  %v971_v62 = vld [vmem:[#allocation5 + $0x80] sm:$0xf0]  ;;  %v970_v63 = vld [vmem:[#allocation5 + $0x7c] sm:$0xf] }
  0x32   : > { %v281_v9 = vmul.f32 128.0, %v1080_v8  ;;  %vm285_vm0 = vweird.f32 %v1080_v8  ;;  %v968_v7 = vld [vmem:[#allocation5 + $0x68] sm:$0xf0]  ;;  %v959_v43 = vld [vmem:[#allocation5 + $0x20] sm:$0xf0]  ;;  %s730_s15 = sshll.u32 %s1510_s20, 4  ;;  %s731_s15 = int_to_ptr.vmem [resolvable:$true] %s730_s15 }
  0x33   : > { %274 = vadd.xlane.f32.xlu2 %v261_v3  ;;  %270 = vadd.xlane.f32.xlu1 %v259_v4  ;;  %v958_v44 = vld [vmem:[#allocation5 + $0x1c] sm:$0xf]  ;;  %v869_v46 = vld [vmem:[#allocation5 + $0x24] sm:$0xf0]  ;;  %v875_v47 = vld [vmem:[#allocation5 + $0x20] sm:$0xf] }
  0x34   : > { %266 = vadd.xlane.f32.xlu0 %v257_v5  ;;  %v282_v10 = vsub.f32 1.0, %v281_v9  ;;  %604 = vmatpush.bf16.msra.mxu0 %v928_v55  ;;  %v960_v48 = vld [vmem:[#allocation5 + $0x28] sm:$0xf0]  ;;  %v872_v49 = vor.u32 %v958_v44, %v869_v46  ;;  %v855_v51 = vld [vmem:[#allocation5] sm:$0xf]  ;;  %s732_s30 = sshll.u32 %s729_s25, 4  ;;  %s733_s30 = int_to_ptr.hbm [resolvable:$true] %s732_s30 }
  0x35   : > { %980 = vmatpush.bf16.msra.mxu3 %v928_v55  ;;  %633 = vmatpush.bf16.msra.mxu1 %v932_v59  ;;  %v876_v50 = vor.u32 %v960_v48, %v875_v47  ;;  %v956_v52 = vld [vmem:[#allocation5 + $0x8] sm:$0xf0]  ;;  %v955_v53 = vld [vmem:[#allocation5 + $0x4] sm:$0xf]  ;;  %v857_v55 = vld [vmem:[#allocation5 + $0xc] sm:$0xf0] }
  0x36   : > { %v283_v11 = vmul.f32 %v1080_v8, %v282_v10  ;;  %662 = vmatpush.bf16.msra.mxu2 %v936_v60  ;;  %v905_v10 = vld [vmem:[#allocation5 + $0x6c] sm:$0xf0]  ;;  %v856_v54 = vor.u32 %v956_v52, %v855_v51  ;;  %v863_v56 = vld [vmem:[#allocation5 + $0x8] sm:$0xf]  ;;  %v957_v57 = vld [vmem:[#allocation5 + $0x10] sm:$0xf0]  ;;  %v860_v59 = vor.u32 %v955_v53, %v857_v55 }
  0x37   : > { %v864_v60 = vor.u32 %v957_v57, %v863_v56  ;;  %s1201_s5 = sshra.s32 %s733_s30, 4  ;;  %s1202_s5 = int_to_ptr.hbm [resolvable:$true] %s1201_s5 }
  0x38   : > { %v284_v12 = vadd.f32 %v1080_v8, %v283_v11  ;;  %v911_v11 = vld [vmem:[#allocation5 + $0x68] sm:$0xf]  ;;  %s1203_s6 = scalar_lea.hbm %s1202_s5, 192  ;;  %p1208_p10 = scmp.lt.s32.totalorder %s1202_s5, %s1602_s3 }
  0x39   : > { %p1204_p1 = scmp.ne.s32.totalorder %s1202_s5, %s1203_s6  ;;  %p1209_p12 = scmp.lt.s32.totalorder %s1207_s21, %s1203_s6 }
  0x3a   : > { %v1429_v13 = vsel %vm285_vm0, %v1080_v8, %v284_v12  ;;  %v967_v8 = vld [vmem:[#allocation5 + $0x64] sm:$0xf]  ;;  %v969_v12 = vld [vmem:[#allocation5 + $0x70] sm:$0xf0] }
  0x3b   : > { %276 = vadd.xlane.f32.xlu2 %v262_v6  ;;  %p1205_p4 = pnand %p1204_p1, %p1387_p7  ;;  %p1210_p13 = por %p1209_p12, %p1208_p10 }
  0x3d   : > { %p1206_p8 = pneg %p1205_p4 }
  0x3f   : > { %p1211_p0 = pnand %p1210_p13, %p1206_p8 }
  0x9e   : > { %v273_v14 = vpop.xlane.xlu2 %272  ;;  %v269_v15 = vpop.xlane.xlu1 %268 }
  0x9f   : > { %v265_v16 = vpop.xlane.xlu0 %264  ;;  %v291_v26 = vmul.f32 %v1429_v13, %v273_v14  ;;  %v289_v27 = vmul.f32 %v1429_v13, %v269_v15  ;;  %v908_v14 = vor.u32 %v967_v8, %v905_v10  ;;  %v912_v15 = vor.u32 %v969_v12, %v911_v11 }
  0xa0   : > { %v287_v17 = vmul.f32 %v1429_v13, %v265_v16  ;;  %v891_v16 = vld [vmem:[#allocation5 + $0x48] sm:$0xf] }
  0xa1   : > { %v1451_v32 = vsub.f32 %v260_v0, %v291_v26  ;;  %v1453_v33 = vsub.f32 %v258_v1, %v289_v27  ;;  %v916_v0 = vor.u32 %v971_v62, %v915_v61  ;;  %v917_v1 = vld [vmem:[#allocation5 + $0x84] sm:$0xf0]  ;;  %v879_v27 = vld [vmem:[#allocation5 + $0x30] sm:$0xf] }
  0xa2   : > { %v1432_v18 = vsub.f32 %v256_v2, %v287_v17  ;;  %v923_v2 = vld [vmem:[#allocation5 + $0x80] sm:$0xf]  ;;  %v965_v17 = vld [vmem:[#allocation5 + $0x50] sm:$0xf0] }
  0xa3   : > { %v307_v38 = vmul.f32 %v1451_v32, %v1451_v32  ;;  %v305_v39 = vmul.f32 %v1453_v33, %v1453_v33  ;;  %605 = vmatpush.bf16.msra.mxu0 %v916_v0  ;;  %981 = vmatpush.bf16.msra.mxu3 %v916_v0 }
  0xa4   : > { %v303_v19 = vmul.f32 %v1432_v18, %v1432_v18 }
  0xa6   : > { %311 = vadd.xlane.f32.xlu0 %v303_v19  ;;  %v275_v20 = vpop.xlane.xlu2 %274  ;;  %v271_v21 = vpop.xlane.xlu1 %270  ;;  %v964_v19 = vld [vmem:[#allocation5 + $0x4c] sm:$0xf] }
  0xa7   : > { %v290_v22 = vmul.f32 %v1429_v13, %v271_v21  ;;  %v267_v23 = vpop.xlane.xlu0 %266  ;;  %v292_v37 = vmul.f32 %v1429_v13, %v275_v20  ;;  %v892_v20 = vor.u32 %v965_v17, %v891_v16  ;;  %v893_v21 = vld [vmem:[#allocation5 + $0x54] sm:$0xf0] }
  0xa8   : > { %v288_v24 = vmul.f32 %v1429_v13, %v267_v23  ;;  %v966_v23 = vld [vmem:[#allocation5 + $0x58] sm:$0xf0] }
  0xa9   : > { %v1438_v25 = vsub.f32 %v259_v4, %v290_v22  ;;  %v1466_v41 = vsub.f32 %v261_v3, %v292_v37  ;;  %v972_v3 = vld [vmem:[#allocation5 + $0x88] sm:$0xf0]  ;;  %v920_v4 = vor.u32 %v970_v63, %v917_v1  ;;  %v899_v22 = vld [vmem:[#allocation5 + $0x50] sm:$0xf]  ;;  %v887_v37 = vld [vmem:[#allocation5 + $0x38] sm:$0xf] }
  0xaa   : > { %v1442_v28 = vsub.f32 %v257_v5, %v288_v24  ;;  %v924_v5 = vor.u32 %v972_v3, %v923_v2  ;;  %v896_v24 = vor.u32 %v964_v19, %v893_v21  ;;  %v900_v26 = vor.u32 %v966_v23, %v899_v22 }
  0xab   : > { %v306_v29 = vmul.f32 %v1438_v25, %v1438_v25  ;;  %v308_v42 = vmul.f32 %v1466_v41, %v1466_v41  ;;  %634 = vmatpush.bf16.msra.mxu1 %v920_v4 }
  0xac   : > { %v304_v31 = vmul.f32 %v1442_v28, %v1442_v28  ;;  %663 = vmatpush.bf16.msra.mxu2 %v924_v5 }
  0xad   : > { %317 = vadd.xlane.f32.xlu2 %v306_v29  ;;  %v962_v29 = vld [vmem:[#allocation5 + $0x38] sm:$0xf0] }
  0xae   : > { %278 = vadd.xlane.f32.xlu0 %v1447_v30  ;;  %313 = vadd.xlane.f32.xlu1 %v304_v31  ;;  %v277_v34 = vpop.xlane.xlu2 %276  ;;  %v961_v31 = vld [vmem:[#allocation5 + $0x34] sm:$0xf] }
  0xaf   : > { %v293_v35 = vmul.f32 %v1429_v13, %v277_v34  ;;  %635 = vmatpush.bf16.msra.mxu1 %v908_v14  ;;  %v880_v34 = vor.u32 %v962_v29, %v879_v27 }
  0xb0   : > { %664 = vmatpush.bf16.msra.mxu2 %v912_v15 }
  0xb1   : > { %v1457_v36 = vsub.f32 %v262_v6, %v293_v35  ;;  %v903_v6 = vld [vmem:[#allocation5 + $0x60] sm:$0xf] }
  0xb2   : > { %v904_v9 = vor.u32 %v968_v7, %v903_v6  ;;  %v881_v35 = vld [vmem:[#allocation5 + $0x3c] sm:$0xf0] }
  0xb3   : > { %v309_v40 = vmul.f32 %v1457_v36, %v1457_v36  ;;  %636 = vmatpush.bf16.msra.mxu1 %v896_v24 }
  0xb4   : > { %606 = vmatpush.bf16.msra.mxu0 %v904_v9  ;;  %982 = vmatpush.bf16.msra.mxu3 %v904_v9 }
  0xb5   : > { %323 = vadd.xlane.f32.xlu2 %v309_v40  ;;  %665 = vmatpush.bf16.msra.mxu2 %v900_v26 }
  0xb6   : > { %319 = vadd.xlane.f32.xlu0 %v307_v38  ;;  %315 = vadd.xlane.f32.xlu1 %v305_v39  ;;  %v963_v38 = vld [vmem:[#allocation5 + $0x40] sm:$0xf0]  ;;  %v884_v39 = vor.u32 %v961_v31, %v881_v35 }
  0xb7   : > { %v888_v40 = vor.u32 %v963_v38, %v887_v37 }
  0xb8   : > { %607 = vmatpush.bf16.msra.mxu0 %v892_v20  ;;  %983 = vmatpush.bf16.msra.mxu3 %v892_v20 }
  0xb9   : > { %637 = vmatpush.bf16.msra.mxu1 %v884_v39  ;;  %666 = vmatpush.bf16.msra.mxu2 %v888_v40 }
  0xbc   : > { %608 = vmatpush.bf16.msra.mxu0 %v880_v34  ;;  %984 = vmatpush.bf16.msra.mxu3 %v880_v34 }
  0xbd   : > { %638 = vmatpush.bf16.msra.mxu1 %v872_v49  ;;  %667 = vmatpush.bf16.msra.mxu2 %v876_v50 }
  0xbe   : > { %321 = vadd.xlane.f32.xlu1 %v308_v42  ;;  %v867_v42 = vld [vmem:[#allocation5 + $0x18] sm:$0xf] }
  0xbf   : > { %v868_v45 = vor.u32 %v959_v43, %v867_v42 }
  0xc1   : > { %609 = vmatpush.bf16.msra.mxu0 %v868_v45  ;;  %985 = vmatpush.bf16.msra.mxu3 %v868_v45 }
  0xc2   : > { %639 = vmatpush.bf16.msra.mxu1 %v860_v59  ;;  %668 = vmatpush.bf16.msra.mxu2 %v864_v60 }
  0xc5   : > { %610 = vmatpush.bf16.msra.mxu0 %v856_v54  ;;  %986 = vmatpush.bf16.msra.mxu3 %v856_v54 }
 0x119   : > { %v312_v58 = vpop.xlane.xlu0 %311 }
 0x11a   : > { %v327_v61 = vmul.f32 %v312_v58, %v1429_v13 }
 0x11c   : > { %v335_v62 = vadd.f32 1e-05, %v327_v61 }
 0x11e   : > { %1081 = vrsqrt.f32 %v335_v62  ;;  %vm349_vm4 = vweird.f32 %v335_v62 }
 0x120   : > { %v318_v63 = vpop.xlane.xlu2 %317 }
 0x121   : > { %v330_v0 = vmul.f32 %v318_v63, %v1429_v13  ;;  %v314_v1 = vpop.xlane.xlu1 %313  ;;  %v279_v2 = vpop.xlane.xlu0 %278 }
 0x122   : > { %v328_v3 = vmul.f32 %v314_v1, %v1429_v13  ;;  %v294_v4 = vmul.f32 %v1429_v13, %v279_v2 }
 0x123   : > { %v338_v5 = vadd.f32 1e-05, %v330_v0 }
 0x124   : > { %v1082_v6 = vpop.eup %1081  ;;  %v336_v7 = vadd.f32 1e-05, %v328_v3  ;;  %v1475_v8 = vsub.f32 %v1447_v30, %v294_v4 }
 0x125   : > { %v344_v9 = vmul.f32 %v1082_v6, %v335_v62  ;;  %1083 = vrsqrt.f32 %v338_v5  ;;  %vm350_vm1 = vweird.f32 %v1082_v6  ;;  %vm379_vm7 = vweird.f32 %v338_v5 }
 0x126   : > { %1085 = vrsqrt.f32 %v336_v7  ;;  %v310_v10 = vmul.f32 %v1475_v8, %v1475_v8  ;;  %vm359_vm2 = vweird.f32 %v336_v7  ;;  %vm1485_vm5 = vmor %vm349_vm4, %vm350_vm1 }
 0x127   : > { %v345_v11 = vmul.f32 %v1082_v6, %v344_v9 }
 0x128   : > { %325 = vadd.xlane.f32.xlu0 %v310_v10 }
 0x129   : > { %v346_v12 = vmul.f32 0.5, %v345_v11  ;;  %v316_v14 = vpop.xlane.xlu1 %315  ;;  %v320_v15 = vpop.xlane.xlu0 %319 }
 0x12a   : > { %v329_v16 = vmul.f32 %v316_v14, %v1429_v13  ;;  %v331_v17 = vmul.f32 %v320_v15, %v1429_v13  ;;  %v324_v11 = vpop.xlane.xlu2 %323 }
 0x12b   : > { %v1084_v19 = vpop.eup %1083  ;;  %v347_v23 = vsub.f32 1.5, %v346_v12  ;;  %v333_v12 = vmul.f32 %v324_v11, %v1429_v13 }
 0x12c   : > { %v1086_v20 = vpop.eup %1085  ;;  %v374_v21 = vmul.f32 %v1084_v19, %v338_v5  ;;  %v337_v30 = vadd.f32 1e-05, %v329_v16  ;;  %v1481_v22 = vadd.f32 1e-05, %v331_v17  ;;  %vm380_vm8 = vweird.f32 %v1084_v19 }
 0x12d   : > { %v354_v24 = vmul.f32 %v1086_v20, %v336_v7  ;;  %v348_v29 = vmul.f32 %v1082_v6, %v347_v23  ;;  %vm360_vm3 = vweird.f32 %v1086_v20  ;;  %vm381_vm11 = vmor %vm379_vm7, %vm380_vm8  ;;  %v341_v14 = vadd.f32 1e-05, %v333_v12 }
 0x12e   : > { %v375_v26 = vmul.f32 %v1084_v19, %v374_v21  ;;  %1087 = vrsqrt.f32 %v337_v30  ;;  %vm361_vm6 = vmor %vm359_vm2, %vm360_vm3  ;;  %vm369_vm9 = vweird.f32 %v337_v30  ;;  %vm389_vm15 = vweird.f32 %v1481_v22 }
 0x12f   : > { %v355_v27 = vmul.f32 %v1086_v20, %v354_v24  ;;  %1089 = vrsqrt.f32 %v1481_v22  ;;  %v352_v46 = vsel %vm1485_vm5, %v1082_v6, %v348_v29  ;;  %vm409_vm3 = vweird.f32 %v341_v14 }
 0x130   : > { %v376_v31 = vmul.f32 0.5, %v375_v26  ;;  %v423_v50 = vmul.f32 %v352_v46, %v1432_v18 }
 0x131   : > { %v356_v34 = vmul.f32 0.5, %v355_v27  ;;  %v322_v35 = vpop.xlane.xlu1 %321 }
 0x132   : > { %v332_v37 = vmul.f32 %v322_v35, %v1429_v13  ;;  %v377_v43 = vsub.f32 1.5, %v376_v31 }
 0x133   : > { %v357_v39 = vsub.f32 1.5, %v356_v34 }
 0x134   : > { %v1088_v40 = vpop.eup %1087  ;;  %v340_v42 = vadd.f32 1e-05, %v332_v37  ;;  %v378_v52 = vmul.f32 %v1084_v19, %v377_v43  ;;  %v467_v37 = vld [vmem:[#allocation7] sm:$0x7] }
 0x135   : > { %v358_v44 = vmul.f32 %v1086_v20, %v357_v39  ;;  %v364_v45 = vmul.f32 %v1088_v40, %v337_v30  ;;  %v1090_v47 = vpop.eup %1089  ;;  %vm370_vm10 = vweird.f32 %v1088_v40  ;;  %v1504_v39 = vperm.slane %v467_v37, 0 }
 0x136   : > { %1091 = vrsqrt.f32 %v340_v42  ;;  %v384_v54 = vmul.f32 %v1090_v47, %v1481_v22  ;;  %vm371_vm12 = vmor %vm369_vm9, %vm370_vm10  ;;  %v382_v61 = vsel %vm381_vm11, %v1084_v19, %v378_v52  ;;  %vm399_vm13 = vweird.f32 %v340_v42 }
 0x137   : > { %v365_v48 = vmul.f32 %v1088_v40, %v364_v45  ;;  %v362_v49 = vsel %vm361_vm6, %v1086_v20, %v358_v44  ;;  %v426_v63 = vmul.f32 %v382_v61, %v1438_v25  ;;  %vm390_vm0 = vweird.f32 %v1090_v47 }
 0x138   : > { %v424_v51 = vmul.f32 %v362_v49, %v1442_v28  ;;  %v385_v59 = vmul.f32 %v1090_v47, %v384_v54  ;;  %vm391_vm2 = vmor %vm389_vm15, %vm390_vm0  ;;  %1093 = vrsqrt.f32 %v341_v14 }
 0x139   : > { %v366_v53 = vmul.f32 0.5, %v365_v48 }
 0x13a   : > { %v431_v55 = vpack.c.bf16 %v424_v51, %v423_v50  ;;  %v386_v0 = vmul.f32 0.5, %v385_v59 }
 0x13b   : > { %v367_v56 = vsub.f32 1.5, %v366_v53 }
 0x13c   : > { %v1092_v57 = vpop.eup %1091  ;;  %611 = vmatmul.bf16.vlgmr.msra.gmra.mxu0 %v431_v55  ;;  %640 = vmatmul.bf16.vlgmr.msra.gmra.mxu1 %v431_v55  ;;  %v387_v4 = vsub.f32 1.5, %v386_v0 }
 0x13d   : > { %v368_v58 = vmul.f32 %v1088_v40, %v367_v56  ;;  %v394_v60 = vmul.f32 %v1092_v57, %v340_v42  ;;  %669 = vmatmul.bf16.vlgmr.msra.gmra.mxu2 %v431_v55  ;;  %vm400_vm14 = vweird.f32 %v1092_v57 }
 0x13e   : > { %vm401_vm1 = vmor %vm399_vm13, %vm400_vm14  ;;  %v388_v6 = vmul.f32 %v1090_v47, %v387_v4  ;;  %v1094_v15 = vpop.eup %1093 }
 0x13f   : > { %v395_v18 = vmul.f32 %v1092_v57, %v394_v60  ;;  %v372_v62 = vsel %vm371_vm12, %v1088_v40, %v368_v58  ;;  %v404_v16 = vmul.f32 %v1094_v15, %v341_v14  ;;  %vm410_vm4 = vweird.f32 %v1094_v15 }
 0x140   : > { %v425_v28 = vmul.f32 %v372_v62, %v1453_v33  ;;  %v392_v33 = vsel %vm391_vm2, %v1090_v47, %v388_v6  ;;  %vm411_vm5 = vmor %vm409_vm3, %vm410_vm4  ;;  %v1506_v40 = vperm.slane %v467_v37, 1 }
 0x141   : > { %v396_v1 = vmul.f32 0.5, %v395_v18  ;;  %v427_v9 = vmul.f32 %v392_v33, %v1451_v32  ;;  %v405_v21 = vmul.f32 %v1094_v15, %v404_v16 }
 0x142   : > { %v432_v2 = vpack.c.bf16 %v426_v63, %v425_v28 }
 0x143   : > { %v397_v3 = vsub.f32 1.5, %v396_v1 }
 0x144   : > { %616 = vmatmul.bf16.vlgmr.msra.gmra.mxu3 %v432_v2 }
 0x145   : > { %v398_v5 = vmul.f32 %v1092_v57, %v397_v3 }
 0x147   : > { %v402_v7 = vsel %vm401_vm1, %v1092_v57, %v398_v5 }
 0x148   : > { %v428_v25 = vmul.f32 %v402_v7, %v1466_v41  ;;  %v406_v41 = vmul.f32 0.5, %v405_v21 }
 0x14a   : > { %v433_v10 = vpack.c.bf16 %v428_v25, %v427_v9  ;;  %v407_v32 = vsub.f32 1.5, %v406_v41 }
 0x14c   : > { %645 = vmatmul.bf16.gmra.mxu1 %v432_v2  ;;  %v408_v24 = vmul.f32 %v1094_v15, %v407_v32 }
 0x14d   : > { %674 = vmatmul.bf16.gmra.mxu2 %v432_v2 }
 0x14e   : > { %v412_v31 = vsel %vm411_vm5, %v1094_v15, %v408_v24 }
 0x14f   : > { %v429_v34 = vmul.f32 %v412_v31, %v1457_v36  ;;  %v1514_v36 = vperm.slane %v467_v37, 2 }
 0x154   : > { %621 = vmatmul.bf16.gmra.mxu3 %v433_v10 }
 0x15c   : > { %650 = vmatmul.bf16.gmra.mxu1 %v433_v10 }
 0x15d   : > { %679 = vmatmul.bf16.gmra.mxu2 %v433_v10 }
 0x19b   : > { %v326_v17 = vpop.xlane.xlu0 %325 }
 0x19c   : > { %v334_v19 = vmul.f32 %v326_v17, %v1429_v13 }
 0x19e   : > { %v342_v20 = vadd.f32 1e-05, %v334_v19 }
 0x1a0   : > { %1095 = vrsqrt.f32 %v342_v20  ;;  %vm419_vm7 = vweird.f32 %v342_v20 }
 0x1a6   : > { %v1096_v30 = vpop.eup %1095 }
 0x1a7   : > { %v414_v22 = vmul.f32 %v1096_v30, %v342_v20  ;;  %vm420_vm6 = vweird.f32 %v1096_v30 }
 0x1a8   : > { %vm421_vm8 = vmor %vm419_vm7, %vm420_vm6 }
 0x1a9   : > { %v415_v23 = vmul.f32 %v1096_v30, %v414_v22 }
 0x1ab   : > { %v416_v26 = vmul.f32 0.5, %v415_v23 }
 0x1ad   : > { %v417_v27 = vsub.f32 1.5, %v416_v26 }
 0x1af   : > { %v418_v29 = vmul.f32 %v1096_v30, %v417_v27 }
 0x1b1   : > { %v422_v13 = vsel %vm421_vm8, %v1096_v30, %v418_v29 }
 0x1b2   : > { %v430_v35 = vmul.f32 %v422_v13, %v1475_v8 }
 0x1b4   : > { %v434_v38 = vpack.c.bf16 %v430_v35, %v429_v34 }
 0x1b6   : > { %626 = vmatmul.bf16.gmra.mxu3 %v434_v38  ;;  %655 = vmatmul.bf16.gmra.mxu1 %v434_v38 }
 0x1b7   : > { %684 = vmatmul.bf16.gmra.mxu2 %v434_v38 }
 0x1b9   : > { %v612_v42 = vpop.f32.mrf.mxu0  ;;  %v641_v43 = vpop.f32.mrf.mxu1 }
 0x1ba   : > { %v613_v44 = vadd.f32 %v612_v42, %v1504_v39  ;;  %v642_v45 = vadd.f32 %v641_v43, %v1506_v40 }
 0x1bc   : > { %690 = vst [vmem:[%s1510_s20] sm:$0xff] %v613_v44 }
 0x1bd   : > { %691 = vst [vmem:[%s1510_s20 + $0x8] sm:$0xff] %v642_v45 }
 0x1c0   : > { %v670_v8 = vpop.f32.mrf.mxu2 }
 0x1c1   : > { %v671_v46 = vadd.f32 %v670_v8, %v1514_v36  ;;  %v614_v47 = vpop.f32.mrf.mxu0  ;;  %v643_v48 = vpop.f32.mrf.mxu1 }
 0x1c2   : > { %v615_v49 = vadd.f32 %v614_v47, %v1504_v39  ;;  %v644_v50 = vadd.f32 %v643_v48, %v1506_v40 }
 0x1c3   : > { %692 = vst [vmem:[%s1510_s20 + $0x10] sm:$0xff] %v671_v46 }
 0x1c4   : > { %693 = vst [vmem:[%s1510_s20 + $0x18] sm:$0xff] %v615_v49 }
 0x1c5   : > { %694 = vst [vmem:[%s1510_s20 + $0x20] sm:$0xff] %v644_v50 }
 0x1c7   : > { %v617_v51 = vpop.f32.mrf.mxu3 }
 0x1c8   : > { %v618_v52 = vadd.f32 %v617_v51, %v1504_v39  ;;  %v672_v53 = vpop.f32.mrf.mxu2 }
 0x1c9   : > { %v673_v54 = vadd.f32 %v672_v53, %v1514_v36  ;;  %v646_v55 = vpop.f32.mrf.mxu1 }
 0x1ca   : > { %696 = vst [vmem:[%s1510_s20 + $0x30] sm:$0xff] %v618_v52  ;;  %v647_v56 = vadd.f32 %v646_v55, %v1506_v40 }
 0x1cb   : > { %695 = vst [vmem:[%s1510_s20 + $0x28] sm:$0xff] %v673_v54 }
 0x1cc   : > { %697 = vst [vmem:[%s1510_s20 + $0x38] sm:$0xff] %v647_v56 }
 0x1cf   : > { %v619_v57 = vpop.f32.mrf.mxu3 }
 0x1d0   : > { %v620_v58 = vadd.f32 %v619_v57, %v1504_v39  ;;  %v675_v59 = vpop.f32.mrf.mxu2 }
 0x1d1   : > { %v676_v60 = vadd.f32 %v675_v59, %v1514_v36  ;;  %v648_v61 = vpop.f32.mrf.mxu1 }
 0x1d2   : > { %699 = vst [vmem:[%s1510_s20 + $0x48] sm:$0xff] %v620_v58  ;;  %v649_v18 = vadd.f32 %v648_v61, %v1506_v40 }
 0x1d3   : > { %698 = vst [vmem:[%s1510_s20 + $0x40] sm:$0xff] %v676_v60 }
 0x1d4   : > { %700 = vst [vmem:[%s1510_s20 + $0x50] sm:$0xff] %v649_v18 }
 0x1d7   : > { %v622_v62 = vpop.f32.mrf.mxu3 }
 0x1d8   : > { %v623_v28 = vadd.f32 %v622_v62, %v1504_v39  ;;  %v677_v63 = vpop.f32.mrf.mxu2 }
 0x1d9   : > { %v678_v0 = vadd.f32 %v677_v63, %v1514_v36  ;;  %v651_v1 = vpop.f32.mrf.mxu1 }
 0x1da   : > { %702 = vst [vmem:[%s1510_s20 + $0x60] sm:$0xff] %v623_v28  ;;  %v652_v2 = vadd.f32 %v651_v1, %v1506_v40 }
 0x1db   : > { %701 = vst [vmem:[%s1510_s20 + $0x58] sm:$0xff] %v678_v0 }
 0x1dc   : > { %703 = vst [vmem:[%s1510_s20 + $0x68] sm:$0xff] %v652_v2 }
 0x1df   : > { %v624_v3 = vpop.f32.mrf.mxu3 }
 0x1e0   : > { %v625_v4 = vadd.f32 %v624_v3, %v1504_v39  ;;  %v680_v5 = vpop.f32.mrf.mxu2 }
 0x1e1   : > { %v681_v6 = vadd.f32 %v680_v5, %v1514_v36  ;;  %v653_v7 = vpop.f32.mrf.mxu1 }
 0x1e2   : > { %705 = vst [vmem:[%s1510_s20 + $0x78] sm:$0xff] %v625_v4  ;;  %v654_v33 = vadd.f32 %v653_v7, %v1506_v40 }
 0x1e3   : > { %704 = vst [vmem:[%s1510_s20 + $0x70] sm:$0xff] %v681_v6 }
 0x1e4   : > { %706 = vst [vmem:[%s1510_s20 + $0x80] sm:$0xff] %v654_v33 }
 0x1e8   : > { %v682_v25 = vpop.f32.mrf.mxu2 }
 0x1e9   : > { %v683_v9 = vadd.f32 %v682_v25, %v1514_v36 }
 0x1eb   : > { %707 = vst [vmem:[%s1510_s20 + $0x88] sm:$0xff] %v683_v9 }
 0x233   : > { %v656_v10 = vpop.f32.mrf.mxu1 }
 0x234   : > { %v657_v11 = vadd.f32 %v656_v10, %v1506_v40 }
 0x236   : > { %709 = vst [vmem:[%s1510_s20 + $0x98] sm:$0xff] %v657_v11 }
 0x239   : > { %v627_v12 = vpop.f32.mrf.mxu3 }
 0x23a   : > { %v628_v14 = vadd.f32 %v627_v12, %v1504_v39  ;;  %v685_v15 = vpop.f32.mrf.mxu2 }
 0x23b   : > { %v686_v16 = vadd.f32 %v685_v15, %v1514_v36  ;;  %v658_v17 = vpop.f32.mrf.mxu1 }
 0x23c   : > { %708 = vst [vmem:[%s1510_s20 + $0x90] sm:$0xff] %v628_v14  ;;  %v659_v19 = vadd.f32 %v658_v17, %v1506_v40 }
 0x23d   : > { %710 = vst [vmem:[%s1510_s20 + $0xa0] sm:$0xff] %v686_v16 }
 0x23e   : > { %712 = vst [vmem:[%s1510_s20 + $0xb0] sm:$0xff] %v659_v19 }
 0x241   : > { %v629_v20 = vpop.f32.mrf.mxu3 }
 0x242   : > { %v630_v21 = vadd.f32 %v629_v20, %v1504_v39  ;;  %v687_v41 = vpop.f32.mrf.mxu2 }
 0x243   : > { %v688_v30 = vadd.f32 %v687_v41, %v1514_v36 }
 0x244   : > { %711 = vst [vmem:[%s1510_s20 + $0xa8] sm:$0xff] %v630_v21 }
 0x245   : > { %713 = vst [vmem:[%s1510_s20 + $0xb8] sm:$0xff] %v688_v30 }
 0x246   : > { %1214 = shalt.err (!%p1211_p0)
}
 0x247   : > { %s1282_s11 = smov 384   ;;  %s1283_s26 = smov 24  }
 0x248   : > { %999 = dma.vmem_to_hbm [thread:$0]  (%p1387_p7), %s731_s15, 3072, %s733_s30, %s715_s4, %s1282_s11, %s1282_s11, %s1283_s26  }
 0x249 PF: > { %s747_s28 = sand.u32 1, %s1253_s12   ;;  %p1013_p3 = pnand %p845_p11, %p1353_p6 }
 0x24a   : > { %s748_s1 = scalar_lea.sflag [#allocation4], %s747_s28 }
 0x24b   : > { %p1014_p5 = pneg %p1013_p3 }
 0x24d   : > { %1248 = dma.done.wait (%p1014_p5), %s748_s1, 3072  }
 0x24e   : > { %1250 = vsyncadd (%p1014_p5), %s748_s1, 4294964224  ;;  %s20_s17 = sadd.s32 1, %s1273_s17   ;;  %s1614_s12 = smov %s1257_s13 }
 0x24f   : > { %p17_p9 = scmp.ge.s32.totalorder %s20_s17, 4   ;;  %s1615_s13 = smov %s1261_s14 }
 0x250   : > { %s1616_s14 = smov %s1396_s29  ;;  %s1617_s15 = smov %s1269_s16 }
 0x251   : > { %s1618_s16 = smov %s1620_s10  ;;  %19 = sbr.rel (!%p17_p9) target bundleno = 9 (0x9), region = 87 }
 0x256   :  { %754 = vsyncpa [#allocation3], 1 }
 0x257   :  { %756 = vsyncpa [#allocation3 + $0x1], 1 }
 0x258   :  { %757 = vsyncpa [#allocation6], 1 }
 0x259   :  { %758 = vsyncpa [#allocation4], 1 }
 0x25a   :  { %760 = vsyncpa [#allocation4 + $0x1], 1 }

</bundles_post_ra>
